<compile_context>
chip_gen: v7x
topology: tpu7x:2x2x1
jax: 0.10.0
libtpu: 0.0.40
codegen_flags: <defaults>
</compile_context>

<pallas_src>
import functools

import jax
import jax.numpy as jnp
import numpy as np
from jax.experimental import pallas as pl
from jax.experimental.pallas import tpu as pltpu


def _mm(a, b, use_bf16):
    """MXU matmul, optional bf16 operands, always f32 accumulation."""
    if use_bf16:
        a = a.astype(jnp.bfloat16)
        b = b.astype(jnp.bfloat16)
    return jnp.dot(a, b, preferred_element_type=jnp.float32)


def _bmm(eq, a, b, use_bf16):
    """Batched MXU matmul via einsum, optional bf16 operands, f32 accumulate."""
    if use_bf16:
        a = a.astype(jnp.bfloat16)
        b = b.astype(jnp.bfloat16)
    return jnp.einsum(eq, a, b, preferred_element_type=jnp.float32)


def _mha_self_attn_kernel(x_q_ref, x_kv_ref, wq_ref, bq_ref, wkv_ref, bkv_ref,
                          wo_ref, bo_ref, gamma_ref, beta_ref,
                          out_ref, *rest,
                          n_head, d_k, inv_scale, eps, use_bf16, return_attn):
    if return_attn:
        attn_ref, kv_scr, ctx_scr = rest
    else:
        attn_ref = None
        kv_scr, ctx_scr = rest

    qt = pl.program_id(1)
    Bt, Sq, D = x_q_ref.shape
    S = x_kv_ref.shape[1]
    Hdk = n_head * d_k

    # K|V projection: once per batch block (q-tile 0), cached in VMEM scratch.
    @pl.when(qt == 0)
    def _():
        xkv = x_kv_ref[...].reshape(Bt * S, D)
        kv = _mm(xkv, wkv_ref[...], use_bf16) + bkv_ref[...]
        kv_scr[...] = kv.reshape(Bt, S, 2 * Hdk)

    # Q projection for this q-tile; softmax scale folded into q.
    x_q = x_q_ref[...]                      # (Bt, Sq, D)
    xq2 = x_q.reshape(Bt * Sq, D)
    q = (_mm(xq2, wq_ref[...], use_bf16) + bq_ref[...]) * inv_scale
    q3 = q.reshape(Bt, Sq, Hdk)

    kv = kv_scr[...]                        # (Bt, S, 2*H*d_k), f32

    # Per-head attention; each head's context goes into a lane slice of a VMEM
    # scratch so the output projection is one full-width MXU pass.
    for h in range(n_head):                 # static unroll, n_head is small
        q_h = q3[:, :, h * d_k:(h + 1) * d_k]
        k_h = kv[:, :, h * d_k:(h + 1) * d_k]
        v_h = kv[:, :, Hdk + h * d_k:Hdk + (h + 1) * d_k]

        # QK^T without materializing a transpose of K.
        scores = _bmm('bqd,bkd->bqk', q_h, k_h, use_bf16)       # (Bt, Sq, S)
        scores = scores - jnp.max(scores, axis=-1, keepdims=True)
        e = jnp.exp(scores)
        p = e * pl.reciprocal(jnp.sum(e, axis=-1, keepdims=True),
                              approx=use_bf16)

        if attn_ref is not None:
            attn_ref[h, :, :, :] = p        # already (head, batch, q, kv)

        ctx_h = _bmm('bqk,bkd->bqd', p, v_h, use_bf16)          # (Bt, Sq, d_k)
        ctx_scr[:, h * d_k:(h + 1) * d_k] = ctx_h.reshape(Bt * Sq, d_k)

    # Output projection (single K = H*d_k matmul) + bias + residual + LayerNorm.
    y = _mm(ctx_scr[...], wo_ref[...], use_bf16) + bo_ref[...] + xq2
    mu = jnp.mean(y, axis=-1, keepdims=True)
    yc = y - mu
    var = jnp.mean(yc * yc, axis=-1, keepdims=True)   # two-pass (stable)
    out = yc * jax.lax.rsqrt(var + eps) * gamma_ref[...] + beta_ref[...]
    out_ref[...] = out.reshape(Bt, Sq, D)

    # TODO(synk): mask / cca=True / ConditionalLayerNorm / cross-attention
    # (q is not k) paths are not implemented.
    # TODO(synk): a kv-tiled online-softmax (flash) variant only pays off when
    # return_attn=False (the module's attention-weights output needs the full
    # kv axis per q-tile anyway); not implemented here.


def prepare_mha_params(params):
    """One-time parameter preparation (fusion / reshapes hoisted out of the
    per-forward-call path)."""
    wq, bq, wk, bk, wv, bv, wo, bo, gamma, beta = params
    wkv = jnp.concatenate([wk, wv], axis=1)                    # (D, 2*H*d_k)
    bkv = jnp.concatenate([bk, bv], axis=0).reshape(1, -1)     # (1, 2*H*d_k)
    return (wq, bq.reshape(1, -1), wkv, bkv, wo, bo.reshape(1, -1),
            gamma.reshape(1, -1), beta.reshape(1, -1))


def _pick_block_q(seq):
    for cand in (256, 128, 64, 32, 16, 8):
        if seq % cand == 0:
            return cand
    return seq


def _vmem_limit_bytes(block_b, block_q, seq, kv_len, d_model, hdk, n_head,
                      return_attn, single_buffer_weights):
    f32 = 4
    weight_elems = (d_model * hdk + hdk            # wq, bq
                    + d_model * 2 * hdk + 2 * hdk  # wkv, bkv
                    + hdk * d_model + d_model      # wo, bo
                    + 2 * d_model)                 # gamma, beta
    weights = weight_elems * f32 * (1 if single_buffer_weights else 2)
    blocks = 2 * f32 * (block_b * block_q * d_model      # x_q (double buffered)
                        + block_b * seq * d_model        # x_kv
                        + block_b * block_q * d_model)   # out
    if return_attn:
        blocks += 2 * f32 * n_head * block_b * block_q * kv_len
    scratch = f32 * (block_b * seq * 2 * hdk + block_b * block_q * hdk)
    need = int(1.3 * (weights + blocks + scratch))
    return int(min(max(need, 16 * 2 ** 20), 100 * 2 ** 20))


def multi_head_attention(q, k, v, prepared_params, *, n_head, d_k,
                         block_b=None, block_q=None, return_attn=True,
                         use_bf16=True, single_buffer_weights=True):
    if not (q is k and k is v):
        # TODO(synk): cross-attention (q != k) path not implemented.
        raise NotImplementedError("only the self-attention path is implemented")
    x = q
    bs, seq, d_model = x.shape
    kv_len = seq
    Hdk = n_head * d_k
    inv_scale = float(1.0 / np.power(d_k, 0.5))
    eps = 1e-5

    wq, bq2, wkv, bkv2, wo, bo2, gamma2, beta2 = prepared_params

    if block_b is None:
        block_b = 1                      # >= 2 grid steps: megacore + overlap
    if block_q is None:
        block_q = _pick_block_q(seq)
    assert bs % block_b == 0, "bs must be divisible by block_b"
    assert seq % block_q == 0 and (block_q % 8 == 0 or block_q == seq)
    n_b = bs // block_b
    n_qt = seq // block_q

    kernel = functools.partial(
        _mha_self_attn_kernel, n_head=n_head, d_k=d_k, inv_scale=inv_scale,
        eps=eps, use_bf16=use_bf16, return_attn=return_attn)

    out_shape = [jax.ShapeDtypeStruct((bs, seq, d_model), jnp.float32)]
    out_specs = [pl.BlockSpec((block_b, block_q, d_model),
                              lambda b, qt: (b, qt, 0))]
    if return_attn:
        # Emitted directly in (head, batch, q, kv) layout, tiled over batch and
        # q so only a (H, block_b, block_q, kv) tile is live per step.  The
        # PyTorch (n_head*bs, seq, kv) result is then a contiguous reshape.
        out_shape.append(
            jax.ShapeDtypeStruct((n_head, bs, seq, kv_len), jnp.float32))
        out_specs.append(
            pl.BlockSpec((n_head, block_b, block_q, kv_len),
                         lambda b, qt: (0, b, qt, 0)))

    scratch_shapes = [
        pltpu.VMEM((block_b, seq, 2 * Hdk), jnp.float32),      # cached K|V
        pltpu.VMEM((block_b * block_q, Hdk), jnp.float32),     # head contexts
    ]

    vmem_limit = _vmem_limit_bytes(block_b, block_q, seq, kv_len, d_model,
                                   Hdk, n_head, return_attn,
                                   single_buffer_weights)

    def build(single_buffer):
        def wspec(arr):
            idx = lambda b, qt, _nd=arr.ndim: (0,) * _nd
            if single_buffer:
                # grid-invariant operands: no double-buffered VMEM window.
                return pl.BlockSpec(arr.shape, idx,
                                    pipeline_mode=pl.Buffered(1))
            return pl.BlockSpec(arr.shape, idx)

        return pl.pallas_call(
            kernel,
            out_shape=tuple(out_shape),
            grid=(n_b, n_qt),
            in_specs=[
                pl.BlockSpec((block_b, block_q, d_model),
                             lambda b, qt: (b, qt, 0)),          # x (q rows)
                pl.BlockSpec((block_b, seq, d_model),
                             lambda b, qt: (b, 0, 0)),           # x (kv rows)
                wspec(wq), wspec(bq2), wspec(wkv), wspec(bkv2),
                wspec(wo), wspec(bo2), wspec(gamma2), wspec(beta2),
            ],
            out_specs=tuple(out_specs),
            scratch_shapes=scratch_shapes,
            compiler_params=pltpu.CompilerParams(
                dimension_semantics=("parallel", "arbitrary"),
                vmem_limit_bytes=vmem_limit),
        )

    args = (x, x, wq, bq2, wkv, bkv2, wo, bo2, gamma2, beta2)
    if single_buffer_weights:
        try:
            results = build(True)(*args)
        except Exception:
            # pl.Buffered(1) not supported by this jax build: fall back to the
            # default (double-buffered) weight windows.
            results = build(False)(*args)
    else:
        results = build(False)(*args)

    ctx = results[0]
    if return_attn:
        # (n_head, bs, seq, kv) -> (n_head*bs, seq, kv); head-major flattening
        # matches the PyTorch index = head * bs + batch.  Contiguous reshape,
        # no transpose pass.
        attn = results[1].reshape(n_head * bs, seq, kv_len)
        return ctx, attn
    return ctx


def _reference(q, k, v, params, *, n_head, d_k):
    """Plain-JAX reference mirroring the PyTorch module (eval mode)."""
    wq, bq, wk, bk, wv, bv, wo, bo, gamma, beta = params
    bs, seq, d_model = q.shape
    kv_len = k.shape[1]
    scale = np.power(d_k, 0.5)

    Q = (q @ wq + bq).reshape(bs, seq, n_head, d_k)
    K = (k @ wk + bk).reshape(bs, kv_len, n_head, d_k)
    V = (v @ wv + bv).reshape(bs, kv_len, n_head, d_k)
    Q = jnp.transpose(Q, (2, 0, 1, 3)).reshape(-1, seq, d_k)
    K = jnp.transpose(K, (2, 0, 1, 3)).reshape(-1, kv_len, d_k)
    V = jnp.transpose(V, (2, 0, 1, 3)).reshape(-1, kv_len, d_k)

    scores = jnp.einsum('bqd,bkd->bqk', Q, K) / scale
    attn = jax.nn.softmax(scores, axis=2)
    ctx = jnp.einsum('bqk,bkd->bqd', attn, V)
    ctx = ctx.reshape(n_head, bs, seq, d_k)
    ctx = jnp.transpose(ctx, (1, 2, 0, 3)).reshape(bs, seq, n_head * d_k)
    out = ctx @ wo + bo
    y = out + q
    mu = jnp.mean(y, axis=-1, keepdims=True)
    var = jnp.mean((y - mu) ** 2, axis=-1, keepdims=True)
    yn = (y - mu) * jax.lax.rsqrt(var + 1e-5)
    return yn * gamma + beta, attn


if __name__ == "__main__":
    # Small, deterministic setup (seq chosen so the q-tile grid axis and the
    # cached-KV path are both exercised: block_q=8 -> 2 q-tiles per batch row).
    n_head, d_k, d_model = 2, 16, 32
    bs, seq = 2, 16

    key = jax.random.PRNGKey(0)
    ks = jax.random.split(key, 9)

    def init_w(k_, shape):
        return jax.random.normal(k_, shape, dtype=jnp.float32) * 0.05

    wq = init_w(ks[0], (d_model, n_head * d_k))
    bq = init_w(ks[1], (n_head * d_k,))
    wk = init_w(ks[2], (d_model, n_head * d_k))
    bk = init_w(ks[3], (n_head * d_k,))
    wv = init_w(ks[4], (d_model, n_head * d_k))
    bv = init_w(ks[5], (n_head * d_k,))
    wo = init_w(ks[6], (n_head * d_k, d_model))
    bo = init_w(ks[7], (d_model,))
    gamma = jnp.ones((d_model,), jnp.float32)
    beta = jnp.zeros((d_model,), jnp.float32)
    params = (wq, bq, wk, bk, wv, bv, wo, bo, gamma, beta)
    prepared = prepare_mha_params(params)   # one-time param fusion

    x = jax.random.normal(ks[8], (bs, seq, d_model), dtype=jnp.float32)
    ref_ctx, ref_attn = _reference(x, x, x, params, n_head=n_head, d_k=d_k)

    # --- strict f32 path -----------------------------------------------------
    ctx, attn = multi_head_attention(x, x, x, prepared,
                                     n_head=n_head, d_k=d_k,
                                     block_b=1, block_q=8,
                                     return_attn=True, use_bf16=False)
    jax.block_until_ready(ctx)
    jax.block_until_ready(attn)
    np.testing.assert_allclose(np.asarray(ctx), np.asarray(ref_ctx),
                               rtol=1e-4, atol=1e-4)
    np.testing.assert_allclose(np.asarray(attn), np.asarray(ref_attn),
                               rtol=1e-4, atol=1e-4)

    # --- bf16-operand MXU path (f32 accumulation), looser tolerance ----------
    ctx_bf, attn_bf = multi_head_attention(x, x, x, prepared,
                                           n_head=n_head, d_k=d_k,
                                           block_b=1, block_q=8,
                                           return_attn=True, use_bf16=True)
    jax.block_until_ready(ctx_bf)
    jax.block_until_ready(attn_bf)
    np.testing.assert_allclose(np.asarray(ctx_bf), np.asarray(ref_ctx),
                               rtol=3e-2, atol=3e-2)
    np.testing.assert_allclose(np.asarray(attn_bf), np.asarray(ref_attn),
                               rtol=3e-2, atol=3e-2)

    print("KERNEL_OK")
</pallas_src>

<mosaic_0001>
module attributes {stable_mosaic.version = 11 : i64} {
  func.func @_mha_self_attn_kernel(%arg0: i32, %arg1: i32, %arg2: memref<1x8x32xf32, #tpu.memory_space<vmem>>, %arg3: memref<1x16x32xf32, #tpu.memory_space<vmem>>, %arg4: memref<32x32xf32, #tpu.memory_space<vmem>>, %arg5: memref<1x32xf32, #tpu.memory_space<vmem>>, %arg6: memref<32x64xf32, #tpu.memory_space<vmem>>, %arg7: memref<1x64xf32, #tpu.memory_space<vmem>>, %arg8: memref<32x32xf32, #tpu.memory_space<vmem>>, %arg9: memref<1x32xf32, #tpu.memory_space<vmem>>, %arg10: memref<1x32xf32, #tpu.memory_space<vmem>>, %arg11: memref<1x32xf32, #tpu.memory_space<vmem>>, %arg12: memref<1x8x32xf32, #tpu.memory_space<vmem>>, %arg13: memref<2x1x8x16xf32, #tpu.memory_space<vmem>>, %arg14: memref<1x16x64xf32, #tpu.memory_space<vmem>>, %arg15: memref<8x32xf32, #tpu.memory_space<vmem>>) attributes {dimension_semantics = [#tpu.dimension_semantics<parallel>, #tpu.dimension_semantics<arbitrary>], iteration_bounds = array<i64: 2, 2>, scalar_prefetch = 0 : i64, scratch_operands = 2 : i64, tpu.core_type = #tpu.core_type<tc>, window_params = [{transform_indices = @transform_0, window_bounds = array<i64: 1, 8, 32>}, {transform_indices = @transform_1, window_bounds = array<i64: 1, 16, 32>}, {pipeline_mode = #tpu.pipeline_mode<synchronous>, transform_indices = @transform_2, window_bounds = array<i64: 32, 32>}, {pipeline_mode = #tpu.pipeline_mode<synchronous>, transform_indices = @transform_3, window_bounds = array<i64: 1, 32>}, {pipeline_mode = #tpu.pipeline_mode<synchronous>, transform_indices = @transform_4, window_bounds = array<i64: 32, 64>}, {pipeline_mode = #tpu.pipeline_mode<synchronous>, transform_indices = @transform_5, window_bounds = array<i64: 1, 64>}, {pipeline_mode = #tpu.pipeline_mode<synchronous>, transform_indices = @transform_6, window_bounds = array<i64: 32, 32>}, {pipeline_mode = #tpu.pipeline_mode<synchronous>, transform_indices = @transform_7, window_bounds = array<i64: 1, 32>}, {pipeline_mode = #tpu.pipeline_mode<synchronous>, transform_indices = @transform_8, window_bounds = array<i64: 1, 32>}, {pipeline_mode = #tpu.pipeline_mode<synchronous>, transform_indices = @transform_9, window_bounds = array<i64: 1, 32>}, {transform_indices = @transform_10, window_bounds = array<i64: 1, 8, 32>}, {transform_indices = @transform_11, window_bounds = array<i64: 2, 1, 8, 16>}]} {
    %c0_i32 = arith.constant 0 : i32
    %0 = arith.cmpi eq, %arg1, %c0_i32 : i32
    %1 = arith.extui %0 : i1 to i32
    %c0_i32_0 = arith.constant 0 : i32
    %2 = arith.cmpi ne, %1, %c0_i32_0 : i32
    scf.if %2 {
      %c0_48 = arith.constant 0 : index
      %c0_49 = arith.constant 0 : index
      %c0_50 = arith.constant 0 : index
      %85 = vector.load %arg3[%c0_48, %c0_49, %c0_50] : memref<1x16x32xf32, #tpu.memory_space<vmem>>, vector<1x16x32xf32>
      %86 = vector.shape_cast %85 : vector<1x16x32xf32> to vector<16x32xf32>
      %c0_51 = arith.constant 0 : index
      %c0_52 = arith.constant 0 : index
      %87 = vector.load %arg6[%c0_51, %c0_52] : memref<32x64xf32, #tpu.memory_space<vmem>>, vector<32x64xf32>
      %cst_53 = arith.constant dense<0.000000e+00> : vector<16x64xf32>
      %88 = tpu.matmul %86, %87, %cst_53 {dimension_numbers = #tpu.dot_dimension_numbers<[1], [0], [0], [1], [0, 0, 1, 1], [], []>} : vector<16x32xf32>, vector<32x64xf32>, vector<16x64xf32> -> vector<16x64xf32>
      %c0_54 = arith.constant 0 : index
      %c0_55 = arith.constant 0 : index
      %89 = vector.load %arg7[%c0_54, %c0_55] : memref<1x64xf32, #tpu.memory_space<vmem>>, vector<1x64xf32>
      %90 = vector.broadcast %89 : vector<1x64xf32> to vector<16x64xf32>
      %91 = arith.addf %88, %90 : vector<16x64xf32>
      %92 = vector.shape_cast %91 : vector<16x64xf32> to vector<1x16x64xf32>
      %c0_56 = arith.constant 0 : index
      %c0_57 = arith.constant 0 : index
      %c0_58 = arith.constant 0 : index
      %93 = vector.load %arg14[%c0_56, %c0_57, %c0_58] : memref<1x16x64xf32, #tpu.memory_space<vmem>>, vector<1x16x64xf32>
      tpu.vector_store %arg14[%c0_56, %c0_57, %c0_58], %92 {strides = array<i32>} : memref<1x16x64xf32, #tpu.memory_space<vmem>>, vector<1x16x64xf32>,
    } else {
    }
    %c0 = arith.constant 0 : index
    %c0_1 = arith.constant 0 : index
    %c0_2 = arith.constant 0 : index
    %3 = vector.load %arg2[%c0, %c0_1, %c0_2] : memref<1x8x32xf32, #tpu.memory_space<vmem>>, vector<1x8x32xf32>
    %4 = vector.shape_cast %3 : vector<1x8x32xf32> to vector<8x32xf32>
    %c0_3 = arith.constant 0 : index
    %c0_4 = arith.constant 0 : index
    %5 = vector.load %arg4[%c0_3, %c0_4] : memref<32x32xf32, #tpu.memory_space<vmem>>, vector<32x32xf32>
    %cst = arith.constant dense<0.000000e+00> : vector<8x32xf32>
    %6 = tpu.matmul %4, %5, %cst {dimension_numbers = #tpu.dot_dimension_numbers<[1], [0], [0], [1], [0, 0, 1, 1], [], []>} : vector<8x32xf32>, vector<32x32xf32>, vector<8x32xf32> -> vector<8x32xf32>
    %c0_5 = arith.constant 0 : index
    %c0_6 = arith.constant 0 : index
    %7 = vector.load %arg5[%c0_5, %c0_6] : memref<1x32xf32, #tpu.memory_space<vmem>>, vector<1x32xf32>
    %8 = vector.broadcast %7 : vector<1x32xf32> to vector<8x32xf32>
    %9 = arith.addf %6, %8 : vector<8x32xf32>
    %cst_7 = arith.constant 2.500000e-01 : f32
    %10 = vector.broadcast %cst_7 : f32 to vector<8x32xf32>
    %11 = arith.mulf %9, %10 : vector<8x32xf32>
    %12 = vector.shape_cast %11 : vector<8x32xf32> to vector<1x8x32xf32>
    %c0_8 = arith.constant 0 : index
    %c0_9 = arith.constant 0 : index
    %c0_10 = arith.constant 0 : index
    %13 = vector.load %arg14[%c0_8, %c0_9, %c0_10] : memref<1x16x64xf32, #tpu.memory_space<vmem>>, vector<1x16x64xf32>
    %14 = vector.extract_strided_slice %12 {offsets = [0, 0, 0], sizes = [1, 8, 16], strides = [1, 1, 1]} : vector<1x8x32xf32> to vector<1x8x16xf32>
    %15 = vector.extract_strided_slice %13 {offsets = [0, 0, 0], sizes = [1, 16, 16], strides = [1, 1, 1]} : vector<1x16x64xf32> to vector<1x16x16xf32>
    %16 = vector.extract_strided_slice %13 {offsets = [0, 0, 32], sizes = [1, 16, 16], strides = [1, 1, 1]} : vector<1x16x64xf32> to vector<1x16x16xf32>
    "tpu.trace_start"() <{level = 10 : i32, message = "bqd,bkd->bqk"}> : () -> ()
    %cst_11 = arith.constant dense<0.000000e+00> : vector<1x8x16xf32>
    %17 = tpu.matmul %14, %15, %cst_11 {dimension_numbers = #tpu.dot_dimension_numbers<[2], [2], [1], [1], [0, 0, 0, 1, 1, 1], [0], [0]>} : vector<1x8x16xf32>, vector<1x16x16xf32>, vector<1x8x16xf32> -> vector<1x8x16xf32>
    "tpu.trace_stop"() : () -> ()
    %cst_12 = arith.constant dense<0xFF800000> : vector<1x8xf32>
    %18 = vector.multi_reduction <maximumf>, %17, %cst_12 [2] : vector<1x8x16xf32> to vector<1x8xf32>
    %19 = vector.shape_cast %18 : vector<1x8xf32> to vector<1x8x1xf32>
    %20 = vector.broadcast %19 : vector<1x8x1xf32> to vector<1x8x16xf32>
    %21 = arith.subf %17, %20 : vector<1x8x16xf32>
    %22 = math.exp %21 : vector<1x8x16xf32>
    %cst_13 = arith.constant dense<0.000000e+00> : vector<1x8xf32>
    %23 = vector.multi_reduction <add>, %22, %cst_13 [2] : vector<1x8x16xf32> to vector<1x8xf32>
    %24 = vector.shape_cast %23 : vector<1x8xf32> to vector<1x8x1xf32>
    %25 = tpu.reciprocal %24 : vector<1x8x1xf32> -> vector<1x8x1xf32>
    %26 = vector.broadcast %25 : vector<1x8x1xf32> to vector<1x8x16xf32>
    %27 = arith.mulf %22, %26 : vector<1x8x16xf32>
    %c0_14 = arith.constant 0 : index
    %c0_15 = arith.constant 0 : index
    %c0_16 = arith.constant 0 : index
    %c0_17 = arith.constant 0 : index
    %28 = vector.load %arg13[%c0_14, %c0_15, %c0_16, %c0_17] : memref<2x1x8x16xf32, #tpu.memory_space<vmem>>, vector<1x1x8x16xf32>
    %29 = vector.shape_cast %28 : vector<1x1x8x16xf32> to vector<1x8x16xf32>
    %30 = vector.shape_cast %27 : vector<1x8x16xf32> to vector<1x1x8x16xf32>
    tpu.vector_store %arg13[%c0_14, %c0_15, %c0_16, %c0_17], %30 {strides = array<i32>} : memref<2x1x8x16xf32, #tpu.memory_space<vmem>>, vector<1x1x8x16xf32>,
    "tpu.trace_start"() <{level = 10 : i32, message = "bqk,bkd->bqd"}> : () -> ()
    %cst_18 = arith.constant dense<0.000000e+00> : vector<1x8x16xf32>
    %31 = tpu.matmul %27, %16, %cst_18 {dimension_numbers = #tpu.dot_dimension_numbers<[2], [1], [1], [2], [0, 0, 0, 1, 1, 2], [0], [0]>} : vector<1x8x16xf32>, vector<1x16x16xf32>, vector<1x8x16xf32> -> vector<1x8x16xf32>
    "tpu.trace_stop"() : () -> ()
    %32 = vector.shape_cast %31 : vector<1x8x16xf32> to vector<8x16xf32>
    %c0_19 = arith.constant 0 : index
    %c0_20 = arith.constant 0 : index
    %33 = vector.load %arg15[%c0_19, %c0_20] : memref<8x32xf32, #tpu.memory_space<vmem>>, vector<8x16xf32>
    tpu.vector_store %arg15[%c0_19, %c0_20], %32 {strides = array<i32>} : memref<8x32xf32, #tpu.memory_space<vmem>>, vector<8x16xf32>,
    %34 = vector.extract_strided_slice %12 {offsets = [0, 0, 16], sizes = [1, 8, 16], strides = [1, 1, 1]} : vector<1x8x32xf32> to vector<1x8x16xf32>
    %35 = vector.extract_strided_slice %13 {offsets = [0, 0, 16], sizes = [1, 16, 16], strides = [1, 1, 1]} : vector<1x16x64xf32> to vector<1x16x16xf32>
    %36 = vector.extract_strided_slice %13 {offsets = [0, 0, 48], sizes = [1, 16, 16], strides = [1, 1, 1]} : vector<1x16x64xf32> to vector<1x16x16xf32>
    "tpu.trace_start"() <{level = 10 : i32, message = "bqd,bkd->bqk"}> : () -> ()
    %cst_21 = arith.constant dense<0.000000e+00> : vector<1x8x16xf32>
    %37 = tpu.matmul %34, %35, %cst_21 {dimension_numbers = #tpu.dot_dimension_numbers<[2], [2], [1], [1], [0, 0, 0, 1, 1, 1], [0], [0]>} : vector<1x8x16xf32>, vector<1x16x16xf32>, vector<1x8x16xf32> -> vector<1x8x16xf32>
    "tpu.trace_stop"() : () -> ()
    %cst_22 = arith.constant dense<0xFF800000> : vector<1x8xf32>
    %38 = vector.multi_reduction <maximumf>, %37, %cst_22 [2] : vector<1x8x16xf32> to vector<1x8xf32>
    %39 = vector.shape_cast %38 : vector<1x8xf32> to vector<1x8x1xf32>
    %40 = vector.broadcast %39 : vector<1x8x1xf32> to vector<1x8x16xf32>
    %41 = arith.subf %37, %40 : vector<1x8x16xf32>
    %42 = math.exp %41 : vector<1x8x16xf32>
    %cst_23 = arith.constant dense<0.000000e+00> : vector<1x8xf32>
    %43 = vector.multi_reduction <add>, %42, %cst_23 [2] : vector<1x8x16xf32> to vector<1x8xf32>
    %44 = vector.shape_cast %43 : vector<1x8xf32> to vector<1x8x1xf32>
    %45 = tpu.reciprocal %44 : vector<1x8x1xf32> -> vector<1x8x1xf32>
    %46 = vector.broadcast %45 : vector<1x8x1xf32> to vector<1x8x16xf32>
    %47 = arith.mulf %42, %46 : vector<1x8x16xf32>
    %c1 = arith.constant 1 : index
    %c0_24 = arith.constant 0 : index
    %c0_25 = arith.constant 0 : index
    %c0_26 = arith.constant 0 : index
    %48 = vector.load %arg13[%c1, %c0_24, %c0_25, %c0_26] : memref<2x1x8x16xf32, #tpu.memory_space<vmem>>, vector<1x1x8x16xf32>
    %49 = vector.shape_cast %48 : vector<1x1x8x16xf32> to vector<1x8x16xf32>
    %50 = vector.shape_cast %47 : vector<1x8x16xf32> to vector<1x1x8x16xf32>
    tpu.vector_store %arg13[%c1, %c0_24, %c0_25, %c0_26], %50 {strides = array<i32>} : memref<2x1x8x16xf32, #tpu.memory_space<vmem>>, vector<1x1x8x16xf32>,
    "tpu.trace_start"() <{level = 10 : i32, message = "bqk,bkd->bqd"}> : () -> ()
    %cst_27 = arith.constant dense<0.000000e+00> : vector<1x8x16xf32>
    %51 = tpu.matmul %47, %36, %cst_27 {dimension_numbers = #tpu.dot_dimension_numbers<[2], [1], [1], [2], [0, 0, 0, 1, 1, 2], [0], [0]>} : vector<1x8x16xf32>, vector<1x16x16xf32>, vector<1x8x16xf32> -> vector<1x8x16xf32>
    "tpu.trace_stop"() : () -> ()
    %52 = vector.shape_cast %51 : vector<1x8x16xf32> to vector<8x16xf32>
    %c0_28 = arith.constant 0 : index
    %c16 = arith.constant 16 : index
    %53 = vector.load %arg15[%c0_28, %c16] : memref<8x32xf32, #tpu.memory_space<vmem>>, vector<8x16xf32>
    tpu.vector_store %arg15[%c0_28, %c16], %52 {strides = array<i32>} : memref<8x32xf32, #tpu.memory_space<vmem>>, vector<8x16xf32>,
    %c0_29 = arith.constant 0 : index
    %c0_30 = arith.constant 0 : index
    %54 = vector.load %arg15[%c0_29, %c0_30] : memref<8x32xf32, #tpu.memory_space<vmem>>, vector<8x32xf32>
    %c0_31 = arith.constant 0 : index
    %c0_32 = arith.constant 0 : index
    %55 = vector.load %arg8[%c0_31, %c0_32] : memref<32x32xf32, #tpu.memory_space<vmem>>, vector<32x32xf32>
    %cst_33 = arith.constant dense<0.000000e+00> : vector<8x32xf32>
    %56 = tpu.matmul %54, %55, %cst_33 {dimension_numbers = #tpu.dot_dimension_numbers<[1], [0], [0], [1], [0, 0, 1, 1], [], []>} : vector<8x32xf32>, vector<32x32xf32>, vector<8x32xf32> -> vector<8x32xf32>
    %c0_34 = arith.constant 0 : index
    %c0_35 = arith.constant 0 : index
    %57 = vector.load %arg9[%c0_34, %c0_35] : memref<1x32xf32, #tpu.memory_space<vmem>>, vector<1x32xf32>
    %58 = vector.broadcast %57 : vector<1x32xf32> to vector<8x32xf32>
    %59 = arith.addf %56, %58 : vector<8x32xf32>
    %60 = arith.addf %59, %4 : vector<8x32xf32>
    %cst_36 = arith.constant dense<0.000000e+00> : vector<8xf32>
    %61 = vector.multi_reduction <add>, %60, %cst_36 [1] : vector<8x32xf32> to vector<8xf32>
    %62 = vector.shape_cast %61 : vector<8xf32> to vector<8x1xf32>
    %cst_37 = arith.constant 3.200000e+01 : f32
    %63 = vector.broadcast %cst_37 : f32 to vector<8x1xf32>
    %64 = arith.divf %62, %63 : vector<8x1xf32>
    %65 = vector.broadcast %64 : vector<8x1xf32> to vector<8x32xf32>
    %66 = arith.subf %60, %65 : vector<8x32xf32>
    %67 = arith.mulf %66, %66 : vector<8x32xf32>
    %cst_38 = arith.constant dense<0.000000e+00> : vector<8xf32>
    %68 = vector.multi_reduction <add>, %67, %cst_38 [1] : vector<8x32xf32> to vector<8xf32>
    %69 = vector.shape_cast %68 : vector<8xf32> to vector<8x1xf32>
    %cst_39 = arith.constant 3.200000e+01 : f32
    %70 = vector.broadcast %cst_39 : f32 to vector<8x1xf32>
    %71 = arith.divf %69, %70 : vector<8x1xf32>
    %cst_40 = arith.constant 9.99999974E-6 : f32
    %72 = vector.broadcast %cst_40 : f32 to vector<8x1xf32>
    %73 = arith.addf %71, %72 : vector<8x1xf32>
    %74 = math.rsqrt %73 : vector<8x1xf32>
    %75 = vector.broadcast %74 : vector<8x1xf32> to vector<8x32xf32>
    %76 = arith.mulf %66, %75 : vector<8x32xf32>
    %c0_41 = arith.constant 0 : index
    %c0_42 = arith.constant 0 : index
    %77 = vector.load %arg10[%c0_41, %c0_42] : memref<1x32xf32, #tpu.memory_space<vmem>>, vector<1x32xf32>
    %78 = vector.broadcast %77 : vector<1x32xf32> to vector<8x32xf32>
    %79 = arith.mulf %76, %78 : vector<8x32xf32>
    %c0_43 = arith.constant 0 : index
    %c0_44 = arith.constant 0 : index
    %80 = vector.load %arg11[%c0_43, %c0_44] : memref<1x32xf32, #tpu.memory_space<vmem>>, vector<1x32xf32>
    %81 = vector.broadcast %80 : vector<1x32xf32> to vector<8x32xf32>
    %82 = arith.addf %79, %81 : vector<8x32xf32>
    %83 = vector.shape_cast %82 : vector<8x32xf32> to vector<1x8x32xf32>
    %c0_45 = arith.constant 0 : index
    %c0_46 = arith.constant 0 : index
    %c0_47 = arith.constant 0 : index
    %84 = vector.load %arg12[%c0_45, %c0_46, %c0_47] : memref<1x8x32xf32, #tpu.memory_space<vmem>>, vector<1x8x32xf32>
    tpu.vector_store %arg12[%c0_45, %c0_46, %c0_47], %83 {strides = array<i32>} : memref<1x8x32xf32, #tpu.memory_space<vmem>>, vector<1x8x32xf32>,
    return
  }
  func.func @transform_0(%arg0: i32, %arg1: i32) -> (i32, i32, i32) {
    %c0_i32 = arith.constant 0 : i32
    %c0_i32_0 = arith.constant 0 : i32
    return %arg0, %arg1, %c0_i32 : i32, i32, i32
  }
  func.func @transform_1(%arg0: i32, %arg1: i32) -> (i32, i32, i32) {
    %c0_i32 = arith.constant 0 : i32
    %c0_i32_0 = arith.constant 0 : i32
    %c0_i32_1 = arith.constant 0 : i32
    return %arg0, %c0_i32, %c0_i32_0 : i32, i32, i32
  }
  func.func @transform_2(%arg0: i32, %arg1: i32) -> (i32, i32) {
    %c0_i32 = arith.constant 0 : i32
    %c0_i32_0 = arith.constant 0 : i32
    %c0_i32_1 = arith.constant 0 : i32
    return %c0_i32, %c0_i32_0 : i32, i32
  }
  func.func @transform_3(%arg0: i32, %arg1: i32) -> (i32, i32) {
    %c0_i32 = arith.constant 0 : i32
    %c0_i32_0 = arith.constant 0 : i32
    %c0_i32_1 = arith.constant 0 : i32
    return %c0_i32, %c0_i32_0 : i32, i32
  }
  func.func @transform_4(%arg0: i32, %arg1: i32) -> (i32, i32) {
    %c0_i32 = arith.constant 0 : i32
    %c0_i32_0 = arith.constant 0 : i32
    %c0_i32_1 = arith.constant 0 : i32
    return %c0_i32, %c0_i32_0 : i32, i32
  }
  func.func @transform_5(%arg0: i32, %arg1: i32) -> (i32, i32) {
    %c0_i32 = arith.constant 0 : i32
    %c0_i32_0 = arith.constant 0 : i32
    %c0_i32_1 = arith.constant 0 : i32
    return %c0_i32, %c0_i32_0 : i32, i32
  }
  func.func @transform_6(%arg0: i32, %arg1: i32) -> (i32, i32) {
    %c0_i32 = arith.constant 0 : i32
    %c0_i32_0 = arith.constant 0 : i32
    %c0_i32_1 = arith.constant 0 : i32
    return %c0_i32, %c0_i32_0 : i32, i32
  }
  func.func @transform_7(%arg0: i32, %arg1: i32) -> (i32, i32) {
    %c0_i32 = arith.constant 0 : i32
    %c0_i32_0 = arith.constant 0 : i32
    %c0_i32_1 = arith.constant 0 : i32
    return %c0_i32, %c0_i32_0 : i32, i32
  }
  func.func @transform_8(%arg0: i32, %arg1: i32) -> (i32, i32) {
    %c0_i32 = arith.constant 0 : i32
    %c0_i32_0 = arith.constant 0 : i32
    %c0_i32_1 = arith.constant 0 : i32
    return %c0_i32, %c0_i32_0 : i32, i32
  }
  func.func @transform_9(%arg0: i32, %arg1: i32) -> (i32, i32) {
    %c0_i32 = arith.constant 0 : i32
    %c0_i32_0 = arith.constant 0 : i32
    %c0_i32_1 = arith.constant 0 : i32
    return %c0_i32, %c0_i32_0 : i32, i32
  }
  func.func @transform_10(%arg0: i32, %arg1: i32) -> (i32, i32, i32) {
    %c0_i32 = arith.constant 0 : i32
    %c0_i32_0 = arith.constant 0 : i32
    return %arg0, %arg1, %c0_i32 : i32, i32, i32
  }
  func.func @transform_11(%arg0: i32, %arg1: i32) -> (i32, i32, i32, i32) {
    %c0_i32 = arith.constant 0 : i32
    %c0_i32_0 = arith.constant 0 : i32
    %c0_i32_1 = arith.constant 0 : i32
    return %c0_i32, %arg0, %arg1, %c0_i32_0 : i32, i32, i32, i32
  }
}

module attributes {stable_mosaic.version = 11 : i64} {
  func.func @_mha_self_attn_kernel(%arg0: i32, %arg1: i32, %arg2: memref<1x8x32xf32, #tpu.memory_space<vmem>>, %arg3: memref<1x16x32xf32, #tpu.memory_space<vmem>>, %arg4: memref<32x32xf32, #tpu.memory_space<vmem>>, %arg5: memref<1x32xf32, #tpu.memory_space<vmem>>, %arg6: memref<32x64xf32, #tpu.memory_space<vmem>>, %arg7: memref<1x64xf32, #tpu.memory_space<vmem>>, %arg8: memref<32x32xf32, #tpu.memory_space<vmem>>, %arg9: memref<1x32xf32, #tpu.memory_space<vmem>>, %arg10: memref<1x32xf32, #tpu.memory_space<vmem>>, %arg11: memref<1x32xf32, #tpu.memory_space<vmem>>, %arg12: memref<1x8x32xf32, #tpu.memory_space<vmem>>, %arg13: memref<2x1x8x16xf32, #tpu.memory_space<vmem>>, %arg14: memref<1x16x64xf32, #tpu.memory_space<vmem>>, %arg15: memref<8x32xf32, #tpu.memory_space<vmem>>) attributes {dimension_semantics = [#tpu.dimension_semantics<parallel>, #tpu.dimension_semantics<arbitrary>], iteration_bounds = array<i64: 2, 2>, scalar_prefetch = 0 : i64, scratch_operands = 2 : i64, tpu.core_type = #tpu.core_type<tc>, window_params = [{transform_indices = @transform_0, window_bounds = array<i64: 1, 8, 32>}, {transform_indices = @transform_1, window_bounds = array<i64: 1, 16, 32>}, {pipeline_mode = #tpu.pipeline_mode<synchronous>, transform_indices = @transform_2, window_bounds = array<i64: 32, 32>}, {pipeline_mode = #tpu.pipeline_mode<synchronous>, transform_indices = @transform_3, window_bounds = array<i64: 1, 32>}, {pipeline_mode = #tpu.pipeline_mode<synchronous>, transform_indices = @transform_4, window_bounds = array<i64: 32, 64>}, {pipeline_mode = #tpu.pipeline_mode<synchronous>, transform_indices = @transform_5, window_bounds = array<i64: 1, 64>}, {pipeline_mode = #tpu.pipeline_mode<synchronous>, transform_indices = @transform_6, window_bounds = array<i64: 32, 32>}, {pipeline_mode = #tpu.pipeline_mode<synchronous>, transform_indices = @transform_7, window_bounds = array<i64: 1, 32>}, {pipeline_mode = #tpu.pipeline_mode<synchronous>, transform_indices = @transform_8, window_bounds = array<i64: 1, 32>}, {pipeline_mode = #tpu.pipeline_mode<synchronous>, transform_indices = @transform_9, window_bounds = array<i64: 1, 32>}, {transform_indices = @transform_10, window_bounds = array<i64: 1, 8, 32>}, {transform_indices = @transform_11, window_bounds = array<i64: 2, 1, 8, 16>}]} {
    %c0_i32 = arith.constant 0 : i32
    %0 = arith.cmpi eq, %arg1, %c0_i32 : i32
    %1 = arith.extui %0 : i1 to i32
    %c0_i32_0 = arith.constant 0 : i32
    %2 = arith.cmpi ne, %1, %c0_i32_0 : i32
    scf.if %2 {
      %c0_48 = arith.constant 0 : index
      %c0_49 = arith.constant 0 : index
      %c0_50 = arith.constant 0 : index
      %85 = vector.load %arg3[%c0_48, %c0_49, %c0_50] : memref<1x16x32xf32, #tpu.memory_space<vmem>>, vector<1x16x32xf32>
      %86 = vector.shape_cast %85 : vector<1x16x32xf32> to vector<16x32xf32>
      %c0_51 = arith.constant 0 : index
      %c0_52 = arith.constant 0 : index
      %87 = vector.load %arg6[%c0_51, %c0_52] : memref<32x64xf32, #tpu.memory_space<vmem>>, vector<32x64xf32>
      %cst_53 = arith.constant dense<0.000000e+00> : vector<16x64xf32>
      %88 = tpu.matmul %86, %87, %cst_53 {dimension_numbers = #tpu.dot_dimension_numbers<[1], [0], [0], [1], [0, 0, 1, 1], [], []>} : vector<16x32xf32>, vector<32x64xf32>, vector<16x64xf32> -> vector<16x64xf32>
      %c0_54 = arith.constant 0 : index
      %c0_55 = arith.constant 0 : index
      %89 = vector.load %arg7[%c0_54, %c0_55] : memref<1x64xf32, #tpu.memory_space<vmem>>, vector<1x64xf32>
      %90 = vector.broadcast %89 : vector<1x64xf32> to vector<16x64xf32>
      %91 = arith.addf %88, %90 : vector<16x64xf32>
      %92 = vector.shape_cast %91 : vector<16x64xf32> to vector<1x16x64xf32>
      %c0_56 = arith.constant 0 : index
      %c0_57 = arith.constant 0 : index
      %c0_58 = arith.constant 0 : index
      %93 = vector.load %arg14[%c0_56, %c0_57, %c0_58] : memref<1x16x64xf32, #tpu.memory_space<vmem>>, vector<1x16x64xf32>
      tpu.vector_store %arg14[%c0_56, %c0_57, %c0_58], %92 {strides = array<i32>} : memref<1x16x64xf32, #tpu.memory_space<vmem>>, vector<1x16x64xf32>,
    } else {
    }
    %c0 = arith.constant 0 : index
    %c0_1 = arith.constant 0 : index
    %c0_2 = arith.constant 0 : index
    %3 = vector.load %arg2[%c0, %c0_1, %c0_2] : memref<1x8x32xf32, #tpu.memory_space<vmem>>, vector<1x8x32xf32>
    %4 = vector.shape_cast %3 : vector<1x8x32xf32> to vector<8x32xf32>
    %c0_3 = arith.constant 0 : index
    %c0_4 = arith.constant 0 : index
    %5 = vector.load %arg4[%c0_3, %c0_4] : memref<32x32xf32, #tpu.memory_space<vmem>>, vector<32x32xf32>
    %cst = arith.constant dense<0.000000e+00> : vector<8x32xf32>
    %6 = tpu.matmul %4, %5, %cst {dimension_numbers = #tpu.dot_dimension_numbers<[1], [0], [0], [1], [0, 0, 1, 1], [], []>} : vector<8x32xf32>, vector<32x32xf32>, vector<8x32xf32> -> vector<8x32xf32>
    %c0_5 = arith.constant 0 : index
    %c0_6 = arith.constant 0 : index
    %7 = vector.load %arg5[%c0_5, %c0_6] : memref<1x32xf32, #tpu.memory_space<vmem>>, vector<1x32xf32>
    %8 = vector.broadcast %7 : vector<1x32xf32> to vector<8x32xf32>
    %9 = arith.addf %6, %8 : vector<8x32xf32>
    %cst_7 = arith.constant 2.500000e-01 : f32
    %10 = vector.broadcast %cst_7 : f32 to vector<8x32xf32>
    %11 = arith.mulf %9, %10 : vector<8x32xf32>
    %12 = vector.shape_cast %11 : vector<8x32xf32> to vector<1x8x32xf32>
    %c0_8 = arith.constant 0 : index
    %c0_9 = arith.constant 0 : index
    %c0_10 = arith.constant 0 : index
    %13 = vector.load %arg14[%c0_8, %c0_9, %c0_10] : memref<1x16x64xf32, #tpu.memory_space<vmem>>, vector<1x16x64xf32>
    %14 = vector.extract_strided_slice %12 {offsets = [0, 0, 0], sizes = [1, 8, 16], strides = [1, 1, 1]} : vector<1x8x32xf32> to vector<1x8x16xf32>
    %15 = vector.extract_strided_slice %13 {offsets = [0, 0, 0], sizes = [1, 16, 16], strides = [1, 1, 1]} : vector<1x16x64xf32> to vector<1x16x16xf32>
    %16 = vector.extract_strided_slice %13 {offsets = [0, 0, 32], sizes = [1, 16, 16], strides = [1, 1, 1]} : vector<1x16x64xf32> to vector<1x16x16xf32>
    "tpu.trace_start"() <{level = 10 : i32, message = "bqd,bkd->bqk"}> : () -> ()
    %cst_11 = arith.constant dense<0.000000e+00> : vector<1x8x16xf32>
    %17 = tpu.matmul %14, %15, %cst_11 {dimension_numbers = #tpu.dot_dimension_numbers<[2], [2], [1], [1], [0, 0, 0, 1, 1, 1], [0], [0]>} : vector<1x8x16xf32>, vector<1x16x16xf32>, vector<1x8x16xf32> -> vector<1x8x16xf32>
    "tpu.trace_stop"() : () -> ()
    %cst_12 = arith.constant dense<0xFF800000> : vector<1x8xf32>
    %18 = vector.multi_reduction <maximumf>, %17, %cst_12 [2] : vector<1x8x16xf32> to vector<1x8xf32>
    %19 = vector.shape_cast %18 : vector<1x8xf32> to vector<1x8x1xf32>
    %20 = vector.broadcast %19 : vector<1x8x1xf32> to vector<1x8x16xf32>
    %21 = arith.subf %17, %20 : vector<1x8x16xf32>
    %22 = math.exp %21 : vector<1x8x16xf32>
    %cst_13 = arith.constant dense<0.000000e+00> : vector<1x8xf32>
    %23 = vector.multi_reduction <add>, %22, %cst_13 [2] : vector<1x8x16xf32> to vector<1x8xf32>
    %24 = vector.shape_cast %23 : vector<1x8xf32> to vector<1x8x1xf32>
    %25 = tpu.reciprocal %24 : vector<1x8x1xf32> -> vector<1x8x1xf32>
    %26 = vector.broadcast %25 : vector<1x8x1xf32> to vector<1x8x16xf32>
    %27 = arith.mulf %22, %26 : vector<1x8x16xf32>
    %c0_14 = arith.constant 0 : index
    %c0_15 = arith.constant 0 : index
    %c0_16 = arith.constant 0 : index
    %c0_17 = arith.constant 0 : index
    %28 = vector.load %arg13[%c0_14, %c0_15, %c0_16, %c0_17] : memref<2x1x8x16xf32, #tpu.memory_space<vmem>>, vector<1x1x8x16xf32>
    %29 = vector.shape_cast %28 : vector<1x1x8x16xf32> to vector<1x8x16xf32>
    %30 = vector.shape_cast %27 : vector<1x8x16xf32> to vector<1x1x8x16xf32>
    tpu.vector_store %arg13[%c0_14, %c0_15, %c0_16, %c0_17], %30 {strides = array<i32>} : memref<2x1x8x16xf32, #tpu.memory_space<vmem>>, vector<1x1x8x16xf32>,
    "tpu.trace_start"() <{level = 10 : i32, message = "bqk,bkd->bqd"}> : () -> ()
    %cst_18 = arith.constant dense<0.000000e+00> : vector<1x8x16xf32>
    %31 = tpu.matmul %27, %16, %cst_18 {dimension_numbers = #tpu.dot_dimension_numbers<[2], [1], [1], [2], [0, 0, 0, 1, 1, 2], [0], [0]>} : vector<1x8x16xf32>, vector<1x16x16xf32>, vector<1x8x16xf32> -> vector<1x8x16xf32>
    "tpu.trace_stop"() : () -> ()
    %32 = vector.shape_cast %31 : vector<1x8x16xf32> to vector<8x16xf32>
    %c0_19 = arith.constant 0 : index
    %c0_20 = arith.constant 0 : index
    %33 = vector.load %arg15[%c0_19, %c0_20] : memref<8x32xf32, #tpu.memory_space<vmem>>, vector<8x16xf32>
    tpu.vector_store %arg15[%c0_19, %c0_20], %32 {strides = array<i32>} : memref<8x32xf32, #tpu.memory_space<vmem>>, vector<8x16xf32>,
    %34 = vector.extract_strided_slice %12 {offsets = [0, 0, 16], sizes = [1, 8, 16], strides = [1, 1, 1]} : vector<1x8x32xf32> to vector<1x8x16xf32>
    %35 = vector.extract_strided_slice %13 {offsets = [0, 0, 16], sizes = [1, 16, 16], strides = [1, 1, 1]} : vector<1x16x64xf32> to vector<1x16x16xf32>
    %36 = vector.extract_strided_slice %13 {offsets = [0, 0, 48], sizes = [1, 16, 16], strides = [1, 1, 1]} : vector<1x16x64xf32> to vector<1x16x16xf32>
    "tpu.trace_start"() <{level = 10 : i32, message = "bqd,bkd->bqk"}> : () -> ()
    %cst_21 = arith.constant dense<0.000000e+00> : vector<1x8x16xf32>
    %37 = tpu.matmul %34, %35, %cst_21 {dimension_numbers = #tpu.dot_dimension_numbers<[2], [2], [1], [1], [0, 0, 0, 1, 1, 1], [0], [0]>} : vector<1x8x16xf32>, vector<1x16x16xf32>, vector<1x8x16xf32> -> vector<1x8x16xf32>
    "tpu.trace_stop"() : () -> ()
    %cst_22 = arith.constant dense<0xFF800000> : vector<1x8xf32>
    %38 = vector.multi_reduction <maximumf>, %37, %cst_22 [2] : vector<1x8x16xf32> to vector<1x8xf32>
    %39 = vector.shape_cast %38 : vector<1x8xf32> to vector<1x8x1xf32>
    %40 = vector.broadcast %39 : vector<1x8x1xf32> to vector<1x8x16xf32>
    %41 = arith.subf %37, %40 : vector<1x8x16xf32>
    %42 = math.exp %41 : vector<1x8x16xf32>
    %cst_23 = arith.constant dense<0.000000e+00> : vector<1x8xf32>
    %43 = vector.multi_reduction <add>, %42, %cst_23 [2] : vector<1x8x16xf32> to vector<1x8xf32>
    %44 = vector.shape_cast %43 : vector<1x8xf32> to vector<1x8x1xf32>
    %45 = tpu.reciprocal %44 : vector<1x8x1xf32> -> vector<1x8x1xf32>
    %46 = vector.broadcast %45 : vector<1x8x1xf32> to vector<1x8x16xf32>
    %47 = arith.mulf %42, %46 : vector<1x8x16xf32>
    %c1 = arith.constant 1 : index
    %c0_24 = arith.constant 0 : index
    %c0_25 = arith.constant 0 : index
    %c0_26 = arith.constant 0 : index
    %48 = vector.load %arg13[%c1, %c0_24, %c0_25, %c0_26] : memref<2x1x8x16xf32, #tpu.memory_space<vmem>>, vector<1x1x8x16xf32>
    %49 = vector.shape_cast %48 : vector<1x1x8x16xf32> to vector<1x8x16xf32>
    %50 = vector.shape_cast %47 : vector<1x8x16xf32> to vector<1x1x8x16xf32>
    tpu.vector_store %arg13[%c1, %c0_24, %c0_25, %c0_26], %50 {strides = array<i32>} : memref<2x1x8x16xf32, #tpu.memory_space<vmem>>, vector<1x1x8x16xf32>,
    "tpu.trace_start"() <{level = 10 : i32, message = "bqk,bkd->bqd"}> : () -> ()
    %cst_27 = arith.constant dense<0.000000e+00> : vector<1x8x16xf32>
    %51 = tpu.matmul %47, %36, %cst_27 {dimension_numbers = #tpu.dot_dimension_numbers<[2], [1], [1], [2], [0, 0, 0, 1, 1, 2], [0], [0]>} : vector<1x8x16xf32>, vector<1x16x16xf32>, vector<1x8x16xf32> -> vector<1x8x16xf32>
    "tpu.trace_stop"() : () -> ()
    %52 = vector.shape_cast %51 : vector<1x8x16xf32> to vector<8x16xf32>
    %c0_28 = arith.constant 0 : index
    %c16 = arith.constant 16 : index
    %53 = vector.load %arg15[%c0_28, %c16] : memref<8x32xf32, #tpu.memory_space<vmem>>, vector<8x16xf32>
    tpu.vector_store %arg15[%c0_28, %c16], %52 {strides = array<i32>} : memref<8x32xf32, #tpu.memory_space<vmem>>, vector<8x16xf32>,
    %c0_29 = arith.constant 0 : index
    %c0_30 = arith.constant 0 : index
    %54 = vector.load %arg15[%c0_29, %c0_30] : memref<8x32xf32, #tpu.memory_space<vmem>>, vector<8x32xf32>
    %c0_31 = arith.constant 0 : index
    %c0_32 = arith.constant 0 : index
    %55 = vector.load %arg8[%c0_31, %c0_32] : memref<32x32xf32, #tpu.memory_space<vmem>>, vector<32x32xf32>
    %cst_33 = arith.constant dense<0.000000e+00> : vector<8x32xf32>
    %56 = tpu.matmul %54, %55, %cst_33 {dimension_numbers = #tpu.dot_dimension_numbers<[1], [0], [0], [1], [0, 0, 1, 1], [], []>} : vector<8x32xf32>, vector<32x32xf32>, vector<8x32xf32> -> vector<8x32xf32>
    %c0_34 = arith.constant 0 : index
    %c0_35 = arith.constant 0 : index
    %57 = vector.load %arg9[%c0_34, %c0_35] : memref<1x32xf32, #tpu.memory_space<vmem>>, vector<1x32xf32>
    %58 = vector.broadcast %57 : vector<1x32xf32> to vector<8x32xf32>
    %59 = arith.addf %56, %58 : vector<8x32xf32>
    %60 = arith.addf %59, %4 : vector<8x32xf32>
    %cst_36 = arith.constant dense<0.000000e+00> : vector<8xf32>
    %61 = vector.multi_reduction <add>, %60, %cst_36 [1] : vector<8x32xf32> to vector<8xf32>
    %62 = vector.shape_cast %61 : vector<8xf32> to vector<8x1xf32>
    %cst_37 = arith.constant 3.200000e+01 : f32
    %63 = vector.broadcast %cst_37 : f32 to vector<8x1xf32>
    %64 = arith.divf %62, %63 : vector<8x1xf32>
    %65 = vector.broadcast %64 : vector<8x1xf32> to vector<8x32xf32>
    %66 = arith.subf %60, %65 : vector<8x32xf32>
    %67 = arith.mulf %66, %66 : vector<8x32xf32>
    %cst_38 = arith.constant dense<0.000000e+00> : vector<8xf32>
    %68 = vector.multi_reduction <add>, %67, %cst_38 [1] : vector<8x32xf32> to vector<8xf32>
    %69 = vector.shape_cast %68 : vector<8xf32> to vector<8x1xf32>
    %cst_39 = arith.constant 3.200000e+01 : f32
    %70 = vector.broadcast %cst_39 : f32 to vector<8x1xf32>
    %71 = arith.divf %69, %70 : vector<8x1xf32>
    %cst_40 = arith.constant 9.99999974E-6 : f32
    %72 = vector.broadcast %cst_40 : f32 to vector<8x1xf32>
    %73 = arith.addf %71, %72 : vector<8x1xf32>
    %74 = math.rsqrt %73 : vector<8x1xf32>
    %75 = vector.broadcast %74 : vector<8x1xf32> to vector<8x32xf32>
    %76 = arith.mulf %66, %75 : vector<8x32xf32>
    %c0_41 = arith.constant 0 : index
    %c0_42 = arith.constant 0 : index
    %77 = vector.load %arg10[%c0_41, %c0_42] : memref<1x32xf32, #tpu.memory_space<vmem>>, vector<1x32xf32>
    %78 = vector.broadcast %77 : vector<1x32xf32> to vector<8x32xf32>
    %79 = arith.mulf %76, %78 : vector<8x32xf32>
    %c0_43 = arith.constant 0 : index
    %c0_44 = arith.constant 0 : index
    %80 = vector.load %arg11[%c0_43, %c0_44] : memref<1x32xf32, #tpu.memory_space<vmem>>, vector<1x32xf32>
    %81 = vector.broadcast %80 : vector<1x32xf32> to vector<8x32xf32>
    %82 = arith.addf %79, %81 : vector<8x32xf32>
    %83 = vector.shape_cast %82 : vector<8x32xf32> to vector<1x8x32xf32>
    %c0_45 = arith.constant 0 : index
    %c0_46 = arith.constant 0 : index
    %c0_47 = arith.constant 0 : index
    %84 = vector.load %arg12[%c0_45, %c0_46, %c0_47] : memref<1x8x32xf32, #tpu.memory_space<vmem>>, vector<1x8x32xf32>
    tpu.vector_store %arg12[%c0_45, %c0_46, %c0_47], %83 {strides = array<i32>} : memref<1x8x32xf32, #tpu.memory_space<vmem>>, vector<1x8x32xf32>,
    return
  }
  func.func @transform_0(%arg0: i32, %arg1: i32) -> (i32, i32, i32) {
    %c0_i32 = arith.constant 0 : i32
    %c0_i32_0 = arith.constant 0 : i32
    return %arg0, %arg1, %c0_i32 : i32, i32, i32
  }
  func.func @transform_1(%arg0: i32, %arg1: i32) -> (i32, i32, i32) {
    %c0_i32 = arith.constant 0 : i32
    %c0_i32_0 = arith.constant 0 : i32
    %c0_i32_1 = arith.constant 0 : i32
    return %arg0, %c0_i32, %c0_i32_0 : i32, i32, i32
  }
  func.func @transform_2(%arg0: i32, %arg1: i32) -> (i32, i32) {
    %c0_i32 = arith.constant 0 : i32
    %c0_i32_0 = arith.constant 0 : i32
    %c0_i32_1 = arith.constant 0 : i32
    return %c0_i32, %c0_i32_0 : i32, i32
  }
  func.func @transform_3(%arg0: i32, %arg1: i32) -> (i32, i32) {
    %c0_i32 = arith.constant 0 : i32
    %c0_i32_0 = arith.constant 0 : i32
    %c0_i32_1 = arith.constant 0 : i32
    return %c0_i32, %c0_i32_0 : i32, i32
  }
  func.func @transform_4(%arg0: i32, %arg1: i32) -> (i32, i32) {
    %c0_i32 = arith.constant 0 : i32
    %c0_i32_0 = arith.constant 0 : i32
    %c0_i32_1 = arith.constant 0 : i32
    return %c0_i32, %c0_i32_0 : i32, i32
  }
  func.func @transform_5(%arg0: i32, %arg1: i32) -> (i32, i32) {
    %c0_i32 = arith.constant 0 : i32
    %c0_i32_0 = arith.constant 0 : i32
    %c0_i32_1 = arith.constant 0 : i32
    return %c0_i32, %c0_i32_0 : i32, i32
  }
  func.func @transform_6(%arg0: i32, %arg1: i32) -> (i32, i32) {
    %c0_i32 = arith.constant 0 : i32
    %c0_i32_0 = arith.constant 0 : i32
    %c0_i32_1 = arith.constant 0 : i32
    return %c0_i32, %c0_i32_0 : i32, i32
  }
  func.func @transform_7(%arg0: i32, %arg1: i32) -> (i32, i32) {
    %c0_i32 = arith.constant 0 : i32
    %c0_i32_0 = arith.constant 0 : i32
    %c0_i32_1 = arith.constant 0 : i32
    return %c0_i32, %c0_i32_0 : i32, i32
  }
  func.func @transform_8(%arg0: i32, %arg1: i32) -> (i32, i32) {
    %c0_i32 = arith.constant 0 : i32
    %c0_i32_0 = arith.constant 0 : i32
    %c0_i32_1 = arith.constant 0 : i32
    return %c0_i32, %c0_i32_0 : i32, i32
  }
  func.func @transform_9(%arg0: i32, %arg1: i32) -> (i32, i32) {
    %c0_i32 = arith.constant 0 : i32
    %c0_i32_0 = arith.constant 0 : i32
    %c0_i32_1 = arith.constant 0 : i32
    return %c0_i32, %c0_i32_0 : i32, i32
  }
  func.func @transform_10(%arg0: i32, %arg1: i32) -> (i32, i32, i32) {
    %c0_i32 = arith.constant 0 : i32
    %c0_i32_0 = arith.constant 0 : i32
    return %arg0, %arg1, %c0_i32 : i32, i32, i32
  }
  func.func @transform_11(%arg0: i32, %arg1: i32) -> (i32, i32, i32, i32) {
    %c0_i32 = arith.constant 0 : i32
    %c0_i32_0 = arith.constant 0 : i32
    %c0_i32_1 = arith.constant 0 : i32
    return %c0_i32, %arg0, %arg1, %c0_i32_0 : i32, i32, i32, i32
  }
}

</mosaic_0001>

<bundles_post_ra>
// kernel: tpu_custom_call.1
= control target key start
LH: loop header
LB: loop body
LE: loop exit
PB: predicated region body
PF: predicated region fallthrough
CT: control target
= control target key end

     0   :  { %s2654_s0 = inlined_call_operand.hbm [shape: f32[2,16,32], index: 0, kind: input, shape index: {}]   ;;  %s2655_s1 = inlined_call_operand.hbm [shape: f32[2,16,32], index: 1, kind: input, shape index: {}]   ;;  %s2656_s2 = inlined_call_operand.hbm [shape: f32[32,32], index: 2, kind: input, shape index: {}]   ;;  %s2657_s3 = inlined_call_operand.vmem [shape: f32[1,32], index: 3, kind: input, shape index: {}]   ;;  %s2658_s4 = inlined_call_operand.hbm [shape: f32[32,64], index: 4, kind: input, shape index: {}]   ;;  %s2659_s5 = inlined_call_operand.vmem [shape: f32[1,64], index: 5, kind: input, shape index: {}]   ;;  %s2660_s6 = inlined_call_operand.hbm [shape: f32[32,32], index: 6, kind: input, shape index: {}]   ;;  %s2661_s7 = inlined_call_operand.vmem [shape: f32[1,32], index: 7, kind: input, shape index: {}]   ;;  %s2662_s8 = inlined_call_operand.vmem [shape: f32[1,32], index: 8, kind: input, shape index: {}]   ;;  %s2663_s9 = inlined_call_operand.vmem [shape: f32[1,32], index: 9, kind: input, shape index: {}]   ;;  %s2664_s10 = inlined_call_operand.hbm [shape: f32[2,16,32], index: 10, kind: output, shape index: {0}]   ;;  %s2665_s11 = inlined_call_operand.hbm [shape: f32[2,2,16,16], index: 11, kind: output, shape index: {1}]  }
   0x1   :  { %2679 = sst [smem:[#allocation26_spill]] %s2654_s0 }
   0x2   :  { %2680 = sst [smem:[#allocation27_spill]] %s2655_s1 }
   0x3   :  { %2681 = sst [smem:[#allocation28_spill]] %s2656_s2 }
   0x4   :  { %2682 = sst [smem:[#allocation29_spill]] %s2657_s3 }
   0x5   :  { %2683 = sst [smem:[#allocation30_spill]] %s2658_s4 }
   0x6   :  { %2684 = sst [smem:[#allocation31_spill]] %s2659_s5 }
   0x7   :  { %2685 = sst [smem:[#allocation32_spill]] %s2660_s6 }
   0x8   :  { %2686 = sst [smem:[#allocation33_spill]] %s2661_s7 }
   0x9   :  { %2687 = sst [smem:[#allocation34_spill]] %s2662_s8 }
   0xa   :  { %2688 = sst [smem:[#allocation35_spill]] %s2663_s9 }
   0xb   :  { %2689 = sst [smem:[#allocation36_spill]] %s2664_s10 }
   0xc   :  { %2690 = sst [smem:[#allocation37_spill]] %s2665_s11 }
   0xd   :  { %17 = vsyncpa [#allocation5], 0 }
   0xe   :  { %19 = vsyncpa [#allocation5 + $0x1], 0 }
   0xf   :  { %20 = vsyncpa [#allocation8], 0 }
  0x10   :  { %22 = vsyncpa [#allocation8 + $0x1], 0 }
  0x11   :  { %23 = vsyncpa [#allocation11], 0 }
  0x12   :  { %24 = vsyncpa [#allocation6], 0 }
  0x13   :  { %26 = vsyncpa [#allocation6 + $0x1], 0 }
  0x14   :  { %27 = vsyncpa [#allocation15], 0 }
  0x15   :  { %29 = vsyncpa [#allocation15 + $0x1], 0  ;;  %s2127_s17 = smov 0   ;;  %s2129_s18 = smov 0  }
  0x16   :  { %s2131_s19 = smov 0   ;;  %s2133_s20 = smov 0  }
  0x17   :  { %s2135_s21 = smov 0   ;;  %s2137_s22 = smov 0  }
  0x18   :  { %s2139_s23 = smov 0   ;;  %s2141_s24 = smov 0  }
  0x19   :  { %s2143_s25 = smov 0   ;;  %s2145_s26 = smov 0  }
  0x1a   :  { %s2147_s27 = smov 0  }
  0x1b LB: > { %2691 = sst [smem:[#allocation22_spill]] %s2030_s23  ;;  %s2181_s28 = sadd.s32 4294967295, %s2046_s27   ;;  %s2046_s27 = sphi %s2147_s27, %s35_s27   ;;  %s2042_s26 = sphi %s2145_s26, %s2748_s26   ;;  %s2038_s25 = sphi %s2143_s25, %s2747_s25   ;;  %s2034_s24 = sphi %s2141_s24, %s2746_s24   ;;  %s2030_s23 = sphi %s2139_s23, %s2745_s23   ;;  %s2026_s22 = sphi %s2137_s22, %s2744_s22   ;;  %s2022_s21 = sphi %s2135_s21, %s2743_s21   ;;  %s2018_s20 = sphi %s2133_s20, %s2742_s20   ;;  %s2014_s19 = sphi %s2131_s19, %s2741_s19   ;;  %s2010_s18 = sphi %s2129_s18, %s2740_s18   ;;  %s2006_s17 = sphi %s2127_s17, %s2739_s17  }
  0x1c   : > { %2692 = sst [smem:[#allocation23_spill]] %s2034_s24  ;;  %p95_p0 = scmp.ne.s32.totalorder %s2010_s18, %s2006_s17 }
  0x1d   : > { %p2668_p1 = scmp.eq.s32.totalorder %s2181_s28, 0  ;;  %p1386_p2 = scmp.ge.s32.totalorder %s2046_s27, 1 }
  0x1e   : > { %p330_p3 = scmp.lt.s32.totalorder %s2046_s27, 5  ;;  %s2048_s12 = smov [#allocation9]  }
  0x1f   : > { %p2189_p4 = por %p95_p0, %p2668_p1  ;;  %s342_s13 = sshll.u32 %s2048_s12, 4  ;;  %s2197_s13 = int_to_ptr.vmem [resolvable:$true] %s342_s13 }
  0x20   : > { %p2193_p5 = pnand %p1386_p2, %p330_p3  ;;  %s2049_s15 = smov [#allocation10]  }
  0x21   : > { %s2693_s29 = scalar_select %p2189_p4, 1, 0 }
  0x22   : > { %s2695_s30 = scalar_select %p2193_p5, 1, 0 }
  0x23   : > { %2694 = sst [smem:[#allocation24_spill]] %s2693_s29  ;;  %p1576_p6 = pneg %p2193_p5 }
  0x24   : > { %s358_s16 = sshll.u32 %s2049_s15, 4  ;;  %s2050_s17 = smov [#allocation12]   ;;  %s2207_s16 = int_to_ptr.vmem [resolvable:$true] %s358_s16 }
  0x25   : > { %p2203_p7 = pnand %p1576_p6, %p2668_p1  ;;  %s2209_s10 = sshll.u32 %s2050_s17, 4  ;;  %s375_s10 = int_to_ptr.vmem [resolvable:$true] %s2209_s10 }
  0x26   : > { %s2697_s2 = sld [smem:[#allocation28_spill]] }
  0x27   : > { %p2219_p9 = pneg %p2203_p7 }
  0x2c   : > { %s1736_s12 = scalar_lea.hbm %s2697_s2, 512 }
  0x2d   : > { %p1737_p8 = scmp.ne.s32.totalorder %s2697_s2, %s1736_s12  ;;  %p1743_p12 = scmp.lt.u32.totalorder %s1736_s12, %s2697_s2 }
  0x2f   : > { %p1739_p10 = pnand %p2219_p9, %p1737_p8 }
  0x31   : > { %p1740_p11 = pneg %p1739_p10 }
  0x33   : > { %p1745_p13 = pnand %p1743_p12, %p1740_p11 }
  0x35   : > { %1748 = shalt.err (!%p1745_p13)
}
  0x36   : > { %s1749_s7 = scalar_lea.vmem %s2197_s13, 512  ;;  %p1757_p6 = scmp.lt.s32.totalorder %s2197_s13, %s2197_s13 }
  0x37   : > { %p1750_p0 = scmp.ne.s32.totalorder %s2197_s13, %s1749_s7  ;;  %p1758_p1 = scmp.lt.s32.totalorder %s1749_s7, %s1749_s7 }
  0x39   : > { %p1752_p2 = pnand %p1750_p0, %p2219_p9  ;;  %p1759_p8 = por %p1758_p1, %p1757_p6 }
  0x3b   : > { %p1753_p3 = pneg %p1752_p2 }
  0x3d   : > { %p1760_p10 = pnand %p1759_p8, %p1753_p3 }
  0x3f   : > { %1763 = shalt.err (!%p1760_p10)
}
  0x40   : > { %s2673_s8 = smov 128   ;;  %s2674_s9 = smov 8  }
  0x41   : > { %1579 = dma.hbm_to_vmem [thread:$0]  (!%p2203_p7), %s2697_s2, 512, %s2197_s13, [#allocation8], %s2673_s8, %s2673_s8, %s2674_s9  }
  0x42   : > { %s2699_s4 = sld [smem:[#allocation30_spill]] }
  0x48   : > { %s1764_s7 = scalar_lea.hbm %s2699_s4, 512 }
  0x49   : > { %p1765_p1 = scmp.ne.s32.totalorder %s2699_s4, %s1764_s7  ;;  %p1771_p13 = scmp.lt.u32.totalorder %s1764_s7, %s2699_s4 }
  0x4b   : > { %p1767_p11 = pnand %p1765_p1, %p2219_p9 }
  0x4d   : > { %p1768_p12 = pneg %p1767_p11 }
  0x4f   : > { %p1773_p0 = pnand %p1771_p13, %p1768_p12 }
  0x51   : > { %1776 = shalt.err (!%p1773_p0)
}
  0x52   : > { %s1777_s13 = scalar_lea.vmem %s2207_s16, 512  ;;  %p1785_p8 = scmp.lt.s32.totalorder %s2207_s16, %s2207_s16 }
  0x53   : > { %p1778_p2 = scmp.ne.s32.totalorder %s2207_s16, %s1777_s13  ;;  %p1786_p10 = scmp.lt.s32.totalorder %s1777_s13, %s1777_s13 }
  0x55   : > { %p1780_p3 = pnand %p1778_p2, %p2219_p9  ;;  %p1787_p1 = por %p1786_p10, %p1785_p8 }
  0x57   : > { %p1781_p6 = pneg %p1780_p3 }
  0x59   : > { %p1788_p11 = pnand %p1787_p1, %p1781_p6 }
  0x5b   : > { %1791 = shalt.err (!%p1788_p11)
}
  0x5c   : > { %1582 = dma.hbm_to_vmem [thread:$0]  (!%p2203_p7), %s2699_s4, 512, %s2207_s16, [#allocation11], %s2673_s8, %s2673_s8, %s2674_s9  }
  0x5d   : > { %s2700_s6 = sld [smem:[#allocation32_spill]] }
  0x63   : > { %s1792_s11 = scalar_lea.hbm %s2700_s6, 512 }
  0x64   : > { %p1793_p12 = scmp.ne.s32.totalorder %s2700_s6, %s1792_s11  ;;  %p1799_p2 = scmp.lt.u32.totalorder %s1792_s11, %s2700_s6 }
  0x66   : > { %p1795_p13 = pnand %p1793_p12, %p2219_p9 }
  0x68   : > { %p1796_p0 = pneg %p1795_p13 }
  0x6a   : > { %p1801_p3 = pnand %p1799_p2, %p1796_p0 }
  0x6c   : > { %1804 = shalt.err (!%p1801_p3)
}
  0x6d   : > { %s1805_s13 = scalar_lea.vmem %s375_s10, 512  ;;  %p1813_p1 = scmp.lt.s32.totalorder %s375_s10, %s375_s10 }
  0x6e   : > { %p1806_p6 = scmp.ne.s32.totalorder %s375_s10, %s1805_s13  ;;  %p1814_p11 = scmp.lt.s32.totalorder %s1805_s13, %s1805_s13 }
  0x70   : > { %p1808_p8 = pnand %p1806_p6, %p2219_p9  ;;  %p1815_p4 = por %p1814_p11, %p1813_p1 }
  0x72   : > { %p1809_p10 = pneg %p1808_p8 }
  0x74   : > { %p1816_p5 = pnand %p1815_p4, %p1809_p10 }
  0x76   : > { %1819 = shalt.err (!%p1816_p5)
}
  0x77   : > { %1585 = dma.hbm_to_vmem [thread:$0]  (!%p2203_p7), %s2700_s6, 512, %s375_s10, [#allocation11], %s2673_s8, %s2673_s8, %s2674_s9  }
  0x78   : > { %s1385_s24 = sadd.s32 4294967294, %s2046_s27   ;;  %s44_s14 = sadd.s32 1, %s2038_s25 }
  0x79   : > { %s47_s5 = sadd.s32 1, %s2042_s26  ;;  %p45_p4 = scmp.ge.s32.totalorder %s44_s14, 2 }
  0x7a   : > { %s56_s23 = sadd.s32 1, %s2026_s22  ;;  %p63_p5 = scmp.ne.s32.totalorder %s2026_s22, %s2022_s21 }
  0x7b   : > { %p64_p9 = scmp.eq.s32.totalorder %s2046_s27, 0  ;;  %s2750_s14 = smov (%p45_p4, %s44_s14), 0 }
  0x7c   : > { %s2752_s5 = smov (!%p45_p4, %s47_s5), %s2042_s26  ;;  %s52_s10 = ssub.s32 %s2038_s25, %s2750_s14 }
  0x7d   : > { %p2306_p7 = por %p64_p9, %p63_p5  ;;  %p49_p12 = scmp.ge.s32.totalorder %s2752_s5, 2 }
  0x7e   : > { %p69_p13 = scmp.ne.s32.totalorder %s2022_s21, %s2018_s20  ;;  %s82_s11 = sadd.s32 1, %s2014_s19 }
  0x7f   : > { %p89_p0 = scmp.ne.s32.totalorder %s2014_s19, %s2010_s18  ;;  %s2754_s5 = smov (%p49_p12, %s2752_s5), 0 }
  0x80   : > { %2702 = sst [smem:[#allocation25_spill]] %s2754_s5  ;;  %p2703_p2 = scmp.eq.s32.totalorder %s2181_s28, 0 }
  0x81   : > { %p2326_p6 = por %p89_p0, %p64_p9  ;;  %s51_s17 = ssub.s32 %s2042_s26, %s2754_s5 }
  0x82   : > { %p2322_p3 = por %p2703_p2, %p69_p13  ;;  %p289_p8 = scmp.eq.s32.totalorder %s2181_s28, 3 }
  0x83   : > { %s53_s7 = sor.u32 %s52_s10, %s51_s17  ;;  %p80_p10 = scmp.eq.s32.totalorder %s51_s17, 0 }
  0x84   : > { %s2704_s12 = scalar_select %p2322_p3, 1, 0 }
  0x85   : > { %p54_p1 = scmp.eq.s32.totalorder %s53_s7, 0  ;;  %p2336_p11 = por %p289_p8, %p63_p5 }
  0x86   : > { %s2341_s16 = scalar_select %p80_p10, %s2014_s19, %s82_s11  }
  0x87   : > { %s2706_s13 = scalar_select %p2336_p11, 1, 0 }
  0x88   : > { %s2344_s3 = scalar_select %p54_p1, %s2026_s22, %s56_s23  }
  0x89   : > { %p295_p4 = scmp.eq.s32.totalorder %s1385_s24, 3  ;;  %p1603_p9 = scmp.lt.s32.totalorder %s2046_s27, 4 }
  0x8a   : > { %s397_s8 = sand.u32 1, %s2026_s22   ;;  %s1392_s9 = sshll.u32 %s2042_s26, 1 }
  0x8b   : > { %p2352_p12 = por %p295_p4, %p69_p13  ;;  %s1391_s17 = sshll.u32 %s397_s8, 3 }
  0x8c   : > { %s406_s7 = sadd.s32 %s2038_s25, %s1392_s9  ;;  %s2708_s0 = sld [smem:[#allocation26_spill]] }
  0x8d   : > { %s2707_s10 = scalar_select %p2352_p12, 1, 0 }
  0x8e   : > { %s1393_s2 = sshll.u32 %s406_s7, 7  ;;  %s401_s24 = scalar_lea.vmem [#allocation4], %s1391_s17 }
  0x8f   : > { %s410_s23 = sshll.u32 %s401_s24, 4  ;;  %p2366_p5 = pnand %p1603_p9, %p2306_p7  ;;  %s2362_s23 = int_to_ptr.vmem [resolvable:$true] %s410_s23 }
  0x90   : > { %p2372_p13 = pnand %p1603_p9, %p2326_p6  ;;  %s398_s6 = scalar_lea.sflag [#allocation5], %s397_s8 }
  0x91   : > { %p1822_p2 = pneg %p2366_p5 }
  0x92   : > { %s2360_s11 = scalar_lea.hbm %s2708_s0, %s1393_s2  ;;  %s1825_s15 = scalar_lea.hbm %s2708_s0, 512 }
  0x93   : > { %s1820_s9 = scalar_lea.hbm %s2360_s11, 128  ;;  %p1826_p6 = scmp.lt.u32.totalorder %s2360_s11, %s2708_s0 }
  0x94   : > { %p1821_p0 = scmp.ne.s32.totalorder %s2360_s11, %s1820_s9  ;;  %p1827_p10 = scmp.lt.u32.totalorder %s1825_s15, %s1820_s9 }
  0x95   : > { %p1829_p4 = scmp.lt.u32.totalorder %s1820_s9, %s2360_s11 }
  0x96   : > { %p1823_p8 = pnand %p1822_p2, %p1821_p0  ;;  %p1828_p1 = por %p1827_p10, %p1826_p6 }
  0x98   : > { %p1824_p7 = pneg %p1823_p8  ;;  %p1830_p9 = por %p1829_p4, %p1828_p1 }
  0x9a   : > { %p1831_p12 = pnand %p1830_p9, %p1824_p7 }
  0x9c   : > { %1834 = shalt.err (!%p1831_p12)
}
  0x9d   : > { %s1835_s8 = scalar_lea.vmem %s2362_s23, 128  ;;  %s2053_s29 = smov [#allocation4]  }
  0x9e   : > { %p1836_p0 = scmp.ne.s32.totalorder %s2362_s23, %s1835_s8  ;;  %s1840_s17 = sshll.u32 %s2053_s29, 4  ;;  %s1841_s17 = int_to_ptr.vmem [resolvable:$false] %s1840_s17 }
  0x9f   : > { %s1842_s7 = scalar_lea.vmem %s1841_s17, 256  ;;  %p1843_p3 = scmp.lt.s32.totalorder %s2362_s23, %s1841_s17 }
  0xa0   : > { %p1838_p8 = pnand %p1836_p0, %p1822_p2  ;;  %p1844_p6 = scmp.lt.s32.totalorder %s1842_s7, %s1835_s8 }
  0xa2   : > { %p1839_p11 = pneg %p1838_p8  ;;  %p1845_p10 = por %p1844_p6, %p1843_p3 }
  0xa4   : > { %p1846_p1 = pnand %p1845_p10, %p1839_p11 }
  0xa6   : > { %1849 = shalt.err (!%p1846_p1)
}
  0xa7   : > { %1589 = dma.hbm_to_vmem [thread:$0]  (!%p2366_p5), %s2360_s11, 128, %s2362_s23, %s398_s6  }
  0xa8   : > { %s419_s9 = sand.u32 1, %s2014_s19   ;;  %s1432_s24 = sshll.u32 %s2042_s26, 8 }
  0xa9   : > { %s1394_s15 = sshll.u32 %s419_s9, 4  ;;  %s2711_s1 = sld [smem:[#allocation27_spill]] }
  0xaa   : > { %s421_s5 = scalar_lea.vmem [#allocation7], %s1394_s15  ;;  %s2712_s7 = sand.u32 1, %s2046_s27  }
  0xab   : > { %s428_s17 = sshll.u32 %s421_s5, 4  ;;  %s2413_s0 = scalar_lea.sflag [#allocation8], %s2712_s7  ;;  %s2409_s17 = int_to_ptr.vmem [resolvable:$true] %s428_s17 }
  0xac   : > { %p1852_p11 = pneg %p2372_p13 }
  0xaf   : > { %s2407_s8 = scalar_lea.hbm %s2711_s1, %s1432_s24  ;;  %s1855_s6 = scalar_lea.hbm %s2711_s1, 512 }
  0xb0   : > { %s1850_s11 = scalar_lea.hbm %s2407_s8, 256  ;;  %p1856_p2 = scmp.lt.u32.totalorder %s2407_s8, %s2711_s1 }
  0xb1   : > { %p1851_p3 = scmp.ne.s32.totalorder %s2407_s8, %s1850_s11  ;;  %p1857_p7 = scmp.lt.u32.totalorder %s1855_s6, %s1850_s11 }
  0xb2   : > { %p1859_p9 = scmp.lt.u32.totalorder %s1850_s11, %s2407_s8 }
  0xb3   : > { %p1853_p12 = pnand %p1852_p11, %p1851_p3  ;;  %p1858_p4 = por %p1857_p7, %p1856_p2 }
  0xb5   : > { %p1854_p5 = pneg %p1853_p12  ;;  %p1860_p0 = por %p1859_p9, %p1858_p4 }
  0xb7   : > { %p1861_p8 = pnand %p1860_p0, %p1854_p5 }
  0xb9   : > { %1864 = shalt.err (!%p1861_p8)
}
  0xba   : > { %s1865_s24 = scalar_lea.vmem %s2409_s17, 256  ;;  %s2054_s29 = smov [#allocation7]  }
  0xbb   : > { %p1866_p6 = scmp.ne.s32.totalorder %s2409_s17, %s1865_s24  ;;  %s1870_s5 = sshll.u32 %s2054_s29, 4  ;;  %s1871_s5 = int_to_ptr.vmem [resolvable:$false] %s1870_s5 }
  0xbc   : > { %s1872_s7 = scalar_lea.vmem %s1871_s5, 512  ;;  %p1873_p3 = scmp.lt.s32.totalorder %s2409_s17, %s1871_s5 }
  0xbd   : > { %p1868_p10 = pnand %p1866_p6, %p1852_p11  ;;  %p1874_p12 = scmp.lt.s32.totalorder %s1872_s7, %s1865_s24 }
  0xbf   : > { %p1869_p1 = pneg %p1868_p10  ;;  %p1875_p2 = por %p1874_p12, %p1873_p3 }
  0xc1   : > { %p1876_p7 = pnand %p1875_p2, %p1869_p1 }
  0xc3   : > { %1879 = shalt.err (!%p1876_p7)
}
  0xc4   : > { %s2713_s11 = smov 8   ;;  %s2714_s23 = smov 128  }
  0xc5   : > { %1592 = dma.hbm_to_vmem [thread:$0]  (!%p2372_p13), %s2407_s8, 256, %s2409_s17, %s2413_s0, %s2714_s23, %s2714_s23, %s2713_s11  }
  0xc6   : > { %p2715_p11 = scmp.ne.s32.totalorder %s2695_s30, 0 }
  0xc7   : > { %s2447_s2 = sand.u32 (!%p2715_p11), 1, %s2022_s21   ;;  %p2716_p5 = scmp.ne.s32.totalorder (!%p2715_p11), %s2704_s12, 0 }
  0xc8   : > { %440 = sbr.rel (%p2715_p11) target bundleno = 2622 (0xa3e), region = 60  ;;  %s1398_s6 = sshll.u32 (!%p2715_p11), %s2447_s2, 3 }
  0xc9   : > { %s443_s9 = scalar_lea.sflag (!%p2715_p11), [#allocation5], %s2447_s2  ;;  %s2451_s15 = scalar_lea.vmem (!%p2715_p11), [#allocation4], %s1398_s6 }
  0xcf   : > { %1981 = dma.done.wait (%p2716_p5), %s443_s9, 128  }
  0xd0   : > { %1983 = vsyncadd (%p2716_p5), %s443_s9, 4294967168  ;;  %s2717_s0 = sld [smem:[#allocation24_spill]]  ;;  %s451_s30 = sand.u32 1, %s2181_s28  }
  0xd1   : > { %s453_s4 = sand.u32 1, %s2010_s18   ;;  %s452_s17 = scalar_lea.sflag [#allocation8], %s451_s30 }
  0xd2   : > { %s1399_s8 = sshll.u32 %s453_s4, 4 }
  0xd3   : > { %s455_s24 = scalar_lea.vmem [#allocation7], %s1399_s8 }
  0xd6   : > { %p2718_p13 = scmp.ne.s32.totalorder %s2717_s0, 0 }
  0xd8   : > { %1985 = dma.done.wait (%p2718_p13), %s452_s17, 256  }
  0xd9   : > { %1987 = vsyncadd (%p2718_p13), %s452_s17, 4294967040  ;;  %p2719_p4 = scmp.eq.s32.totalorder %s2181_s28, 0 }
  0xdb   : > { %1989 = dma.done.wait (%p2719_p4), [#allocation8], 512   ;;  %p2720_p9 = pmov %p2719_p4 }
  0xdc   : > { %p2721_p0 = pmov %p2719_p4 }
  0xdd   : > { %1991 = vsyncadd (%p2720_p9), [#allocation8], 4294966784 }
  0xde   : > { %1993 = dma.done.wait (%p2721_p0), [#allocation11], 1024   ;;  %p2722_p8 = pmov %p2721_p0 }
  0xdf   : > { %s1404_s12 = sshll.u32 %s2447_s2, 4  ;;  %s2472_s29 = scalar_lea.vmem [#allocation13], %s1398_s6 }
  0xe0   : > { %1995 = vsyncadd (%p2722_p8), [#allocation11], 4294966272  ;;  %s2474_s5 = scalar_lea.vmem [#allocation14], %s1404_s12  ;;  %s2723_s7 = sld [smem:[#allocation22_spill]] }
  0xe6   : > { %p1405_p6 = scmp.ne.s32.totalorder %s2723_s7, 0 }
  0xe7   : > { %v522_v0 = vld [vmem:[#allocation10] sm:$0xff] (!%p1405_p6)  ;;  %v523_v1 = vld [vmem:[#allocation10 + $0x8] sm:$0xff] (!%p1405_p6)  ;;  %v524_v2 = vld [vmem:[#allocation10 + $0x10] sm:$0xff] (!%p1405_p6)  ;;  %vm533_vm0 = vcmask (!%p1405_p6), 261120   ;;  %s2724_s23 = sld [smem:[#allocation31_spill]] (!%p1405_p6)  ;;  %vm615_vm1 = vcmask (!%p1405_p6), 523264  }
  0xe8   : > { %519 = sbr.rel (%p1405_p6) target bundleno = 458 (0x1ca), region = 84  ;;  %v1522_v3 = vpack.c.bf16 (!%p1405_p6), %v523_v1, %v522_v0  ;;  %v525_v4 = vld [vmem:[#allocation10 + $0x18] sm:$0xff] (!%p1405_p6)  ;;  %v520_v5 = vld [vmem:[%s455_s24] sm:$0xff] (!%p1405_p6) }
  0xe9   : > { %v1526_v6 = vpack.c.bf16 (!%p1405_p6), %v525_v4, %v524_v2  ;;  %1469 = vmatprep.mubr.msk.f32.mxu0 (!%p1405_p6), %vm533_vm0, %v520_v5  ;;  %v521_v7 = vld [vmem:[%s455_s24 + $0x8] sm:$0xff] (!%p1405_p6) }
  0xea   : > { %1523 = vmatprep.subr.bf16.mxu0 (!%p1405_p6), %v1522_v3 }
  0xeb   : > { %1525 = vmatpush3.bf16.msra.mxu0 (!%p1405_p6), %v1522_v3 }
  0xec   : > { %1527 = vmatprep.subr.bf16.mxu0 (!%p1405_p6), %v1526_v6 }
  0xed   : > { %v1406_v8 = vld [vmem:[%s2724_s23] ss:$0 sm:$0xff] (!%p1405_p6) }
  0xef   : > { %1529 = vmatpush3.bf16.msra.mxu0 %v1526_v6 }
  0xf2   : > { %1470 = vmatmul.mubr.msk.f32.vlgmr.msra.gmra.mrb[0].mxu0 %vm533_vm0, %v521_v7 }
 0x1c5   : > { %v1471_v9 = vpop.f32.mrb[0].mxu0 }
 0x1c6   : > { %v612_v10 = vadd.f32 %v1471_v9, %v1406_v8  ;;  %v606_v11 = vpop.f32.mrb[1].mxu0 }
 0x1c7   : > { %v607_v12 = vadd.f32 %v1406_v8, %v606_v11 }
 0x1c8   : > { %617 = vst.msk [vmem:[#allocation2 + $0x8] sm:$0xff] %vm615_vm1, %v612_v10 }
 0x1c9   : > { %616 = vst.msk [vmem:[#allocation2] sm:$0xff] %vm615_vm1, %v607_v12 }
 0x1ca PF: > { %v619_v13 = vld [vmem:[#allocation9] sm:$0xff]  ;;  %v620_v14 = vld [vmem:[#allocation9 + $0x8] sm:$0xff]  ;;  %v621_v15 = vld [vmem:[#allocation9 + $0x10] sm:$0xff]  ;;  %v2055_v16 = vmov 0.0|0.0   ;;  %vm2056_vm2 = vmmov 0   ;;  %v2057_v19 = vmov 0.0  }
 0x1cb   : > { %1530 = vmatprep.subr.bf16.mxu0 %v2055_v16  ;;  %v1531_v17 = vpack.c.bf16 %v620_v14, %v619_v13  ;;  %v622_v18 = vld [vmem:[#allocation9 + $0x18] sm:$0xff]  ;;  %1480 = vmatprep.mubr.msk.f32.mxu0 %vm2056_vm2, %v2057_v19  ;;  %vm707_vm3 = vcmask 130048   ;;  %vm630_vm5 = vcmask 261120   ;;  %s2727_s0 = sld [smem:[#allocation29_spill]]  ;;  %s2059_s30 = smov 112   ;;  %v1060_v5 = vld [vmem:[#allocation12] sm:$0xff] }
 0x1cc   : > { %1536 = vmatprep.subr.bf16.mxu1 %v2055_v16  ;;  %vm2486_vm4 = vmpackc.low %vm707_vm3, %vm707_vm3  ;;  %1487 = vmatprep.mubr.msk.f32.mxu1 %vm2056_vm2, %v2057_v19  ;;  %v1534_v23 = vpack.c.bf16 %v622_v18, %v621_v15  ;;  %v2497_v25 = vld [vmem:[%s2451_s15] sm:$0xff]  ;;  %s2058_s15 = smov 96   ;;  %s2060_s4 = smov 80   ;;  %v1061_v6 = vld [vmem:[#allocation12 + $0x8] sm:$0xff]  ;;  %vm1057_vm6 = vcmask 261248  }
 0x1cd   : > { %1532 = vmatpush3.bf16.msra.mxu0 %v1531_v17  ;;  %v1551_v7 = vpack.c.bf16 %v1061_v6, %v1060_v5  ;;  %v1062_v8 = vld [vmem:[#allocation12 + $0x10] sm:$0xff]  ;;  %v1063_v9 = vld [vmem:[#allocation12 + $0x18] sm:$0xff]  ;;  %s2061_s8 = smov 16   ;;  %s2728_s17 = sld [smem:[#allocation23_spill]] }
 0x1ce   : > { %1533 = vmatprep.subr.bf16.mxu0 %v2055_v16  ;;  %v1554_v10 = vpack.c.bf16 %v1063_v9, %v1062_v8  ;;  %s2729_s24 = sld [smem:[#allocation22_spill]]  ;;  %s2730_s28 = sld [smem:[#allocation33_spill]] }
 0x1cf   : > { %v706_v21 = vld [vmem:[#allocation2 + $0x8] sm:$0xff]  ;;  %p2732_p1 = scmp.ne.s32.totalorder %s2706_s13, 0 }
 0x1d0   : > { %v705_v20 = vld [vmem:[#allocation2] sm:$0xff] }
 0x1d1   : > { %v1537_v24 = vpack.c.bf16 %v706_v21, %v705_v20  ;;  %1535 = vmatpush3.bf16.msra.mxu0 %v1534_v23  ;;  %v1409_v26 = vld [vmem:[%s2727_s0] ss:$0 sm:$0xff]  ;;  %v1711_v34 = vpack.i.bf16 %v706_v21, %v705_v20 }
 0x1d2   : > { %1547 = vmatprep.subr.bf16.mxu0 %v2055_v16 }
 0x1d3   : > { %1539 = vmatpush3.bf16.xpose.msk.msra.mxu1 %vm2486_vm4, %v1537_v24  ;;  %1712 = vrot.lane.b32.xlu1 %v1711_v34, %s2058_s15  ;;  %s1426_s11 = sshll.u32 %s2728_s17, 1  ;;  %s2731_s15 = sld [smem:[#allocation37_spill]] }
 0x1d4   : > { %1540 = vmatprep.subr.bf16.mxu1 %v2055_v16  ;;  %1481 = vmatmul.mubr.msk.f32.vlgmr.msra.gmra.mrb[0].mxu0 %vm630_vm5, %v2497_v25  ;;  %v1420_v15 = vld [vmem:[%s2730_s28] ss:$0 sm:$0xff]  ;;  %s2540_s23 = sadd.s32 %s2729_s24, %s1426_s11  ;;  %s2062_s17 = smov [#allocation14]  }
 0x1d5   : > { %1508 = vmatprep.mubr.msk.f32.mxu0 %vm2056_vm2, %v2057_v19  ;;  %s2678_s6 = sshll.u32 %s2540_s23, 7  ;;  %s1884_s24 = sshll.u32 %s2062_s17, 4  ;;  %s1885_s24 = int_to_ptr.vmem [resolvable:$false] %s1884_s24 }
 0x1d6   : > { %s1886_s7 = scalar_lea.vmem %s1885_s24, 512 }
 0x1d7   : > { %1717 = vrot.lane.b32.xlu1 %v1711_v34, %s2059_s30 }
 0x245   : > { %v1713_v40 = vpop.permute.xlu1 %1712 }
 0x246   : > { %v1715_v41 = vunpack.i.h.bf16 %v1713_v40  ;;  %v1714_v42 = vunpack.i.l.bf16 %v1713_v40 }
 0x248   : > { %v1541_v43 = vpack.c.bf16 %v1715_v41, %v1714_v42 }
 0x249   : > { %v1718_v45 = vpop.permute.xlu1 %1717 }
 0x24a   : > { %v1720_v46 = vunpack.i.h.bf16 %v1718_v45  ;;  %v1719_v47 = vunpack.i.l.bf16 %v1718_v45 }
 0x24c   : > { %v1544_v49 = vpack.c.bf16 %v1720_v46, %v1719_v47 }
 0x2a7   : > { %v700_v27 = vpop.f32.mrb[0].mxu0 }
 0x2a8   : > { %v701_v28 = vadd.f32 %v1409_v26, %v700_v27  ;;  %v1482_v29 = vpop.f32.mrb[1].mxu0 }
 0x2aa   : > { %v704_v30 = vmul.f32 0.25, %v701_v28 }
 0x2ac   : > { %1488 = vmatmul.mubr.msk.f32.vlgmr.msra.gmra.mrb[0].mxu1 %vm707_vm3, %v704_v30 }
 0x2ad   : > { %1494 = vmatprep.mubr.msk.f32.mxu1 %vm2056_vm2, %v2057_v19  ;;  %1542 = vmatpush3.bf16.msra.mxu1 %v1541_v43 }
 0x2ae   : > { %1543 = vmatprep.subr.bf16.mxu1 %v2055_v16 }
 0x37f   : > { %v783_v31 = vpop.f32.mrb[0].mxu1 }
 0x380   : > { %v1489_v32 = vpop.f32.mrb[1].mxu1  ;;  %v787_v33 = vsel %vm707_vm3, %v783_v31, -inf }
 0x381   : > { %788 = vmax.xlane.f32.xlu0 %v787_v33 }
 0x40e   : > { %v789_v35 = vpop.xlane.xlu0 %788 }
 0x40f   : > { %v790_v36 = vsub.f32 %v783_v31, %v789_v35 }
 0x411   : > { %v791_v37 = vmul.f32 1.442695, %v790_v36 }
 0x413   : > { %1726 = vpow2.f32 %v791_v37 }
 0x41d   : > { %v1727_v38 = vpop.eup %1726 }
 0x41e   : > { %v793_v39 = vsel %vm707_vm3, %v1727_v38, 0.0 }
 0x41f   : > { %794 = vadd.xlane.f32.xlu0 %v793_v39 }
 0x435   : > { %879 = vrot.lane.b32.xlu0 %v704_v30, %s2059_s30  ;;  %s2548_s30 = scalar_lea.hbm %s2731_s15, %s2678_s6 }
 0x4ac   : > { %v795_v44 = vpop.xlane.xlu0 %794 }
 0x4ad   : > { %1728 = vrcp.f32 %v795_v44 }
 0x4b0   : > { %v880_v51 = vpop.permute.xlu0 %879 }
 0x4b7   : > { %v1729_v48 = vpop.eup %1728 }
 0x4b8   : > { %v797_v50 = vmul.f32 %v1729_v48, %v1727_v38 }
 0x4ba   : > { %798 = vst.msk [vmem:[%s2474_s5] sm:$0xff] %vm707_vm3, %v797_v50  ;;  %1495 = vmatmul.mubr.msk.f32.vlgmr.msra.gmra.mrb[2].mxu1 %vm707_vm3, %v797_v50 }
 0x4bb   : > { %1546 = vmatpush3.bf16.xpose.msk.msra.mxu1 %vm2486_vm4, %v1544_v49  ;;  %1501 = vmatprep.mubr.msk.f32.mxu1 %vm2056_vm2, %v2057_v19 }
 0x4c2   : > { %1502 = vmatmul.mubr.msk.f32.vlgmr.msra.gmra.mrb[4].mxu1 %vm707_vm3, %v880_v51 }
 0x58d   : > { %v874_v52 = vpop.f32.mrb[2].mxu1 }
 0x58e   : > { %878 = vst.msk [vmem:[#allocation3] sm:$0xff] %vm707_vm3, %v874_v52  ;;  %v1496_v53 = vpop.f32.mrb[3].mxu1 }
 0x595   : > { %v957_v54 = vpop.f32.mrb[4].mxu1 }
 0x596   : > { %v1503_v55 = vpop.f32.mrb[5].mxu1  ;;  %v961_v56 = vsel %vm707_vm3, %v957_v54, -inf }
 0x597   : > { %962 = vmax.xlane.f32.xlu1 %v961_v56 }
 0x5a8   : > { %1722 = vrot.lane.b32.xlu1 %v1711_v34, %s2060_s4  ;;  %s1211_s4 = sshll.u32 %s2474_s5, 4  ;;  %s2551_s4 = int_to_ptr.vmem [resolvable:$true] %s1211_s4 }
 0x5a9   : > { %s1880_s12 = scalar_lea.vmem %s2551_s4, 256  ;;  %p1887_p2 = scmp.lt.s32.totalorder %s2551_s4, %s1885_s24 }
 0x5aa   : > { %p1881_p10 = scmp.ne.s32.totalorder %s2551_s4, %s1880_s12  ;;  %p1888_p7 = scmp.lt.s32.totalorder %s1886_s7, %s1880_s12 }
 0x5ac   : > { %p1882_p3 = pnand %p1881_p10, %p2732_p1  ;;  %p1889_p11 = por %p1888_p7, %p1887_p2 }
 0x5ae   : > { %p1883_p12 = pneg %p1882_p3 }
 0x5b0   : > { %p1890_p5 = pnand %p1889_p11, %p1883_p12 }
 0x624   : > { %v963_v57 = vpop.xlane.xlu1 %962 }
 0x625   : > { %v964_v58 = vsub.f32 %v957_v54, %v963_v57 }
 0x627   : > { %v965_v59 = vmul.f32 1.442695, %v964_v58 }
 0x628   : > { %v1723_v62 = vpop.permute.xlu1 %1722 }
 0x629   : > { %1730 = vpow2.f32 %v965_v59  ;;  %v1725_v63 = vunpack.i.h.bf16 %v1723_v62  ;;  %v1724_v0 = vunpack.i.l.bf16 %v1723_v62 }
 0x62b   : > { %v1548_v1 = vpack.c.bf16 %v1725_v63, %v1724_v0 }
 0x62d   : > { %1549 = vmatpush3.bf16.msra.mxu0 %v1548_v1 }
 0x62e   : > { %1550 = vmatprep.subr.bf16.mxu0 %v2055_v16 }
 0x633   : > { %v1731_v60 = vpop.eup %1730 }
 0x634   : > { %v967_v61 = vsel %vm707_vm3, %v1731_v60, 0.0 }
 0x635   : > { %968 = vadd.xlane.f32.xlu0 %v967_v61 }
 0x6c2   : > { %v969_v2 = vpop.xlane.xlu0 %968 }
 0x6c3   : > { %1732 = vrcp.f32 %v969_v2 }
 0x6cd   : > { %v1733_v3 = vpop.eup %1732 }
 0x6ce   : > { %v971_v4 = vmul.f32 %v1733_v3, %v1731_v60 }
 0x6d0   : > { %1418 = vst.msk [vmem:[%s2474_s5 + $0x8] sm:$0xff] %vm707_vm3, %v971_v4  ;;  %1509 = vmatmul.mubr.msk.f32.vlgmr.msra.gmra.mrb[2].mxu0 %vm707_vm3, %v971_v4 }
 0x6d1   : > { %1519 = vmatprep.mubr.msk.f32.mxu0 %vm2056_vm2, %v2057_v19  ;;  %1552 = vmatpush3.bf16.msra.mxu0 %v1551_v7 }
 0x6d2   : > { %1553 = vmatprep.subr.bf16.mxu0 %v2055_v16 }
 0x6d5   : > { %1555 = vmatpush3.bf16.msra.mxu0 %v1554_v10 }
 0x7a3   : > { %v1049_v11 = vpop.f32.mrb[2].mxu0 }
 0x7a4   : > { %1054 = vrot.lane.b32.xlu0 %v1049_v11, %s2061_s8  ;;  %v1510_v12 = vpop.f32.mrb[3].mxu0  ;;  %s1182_s8 = scalar_lea.sflag [#allocation15], %s2447_s2 }
 0x816   : > { %v1055_v13 = vpop.permute.xlu0 %1054 }
 0x817   : > { %1058 = vst.msk [vmem:[#allocation3] sm:$0xff] %vm1057_vm6, %v1055_v13 }
 0x81e   : > { %v1059_v14 = vld [vmem:[#allocation3] sm:$0xff] }
 0x81f   : > { %1520 = vmatmul.mubr.msk.f32.vlgmr.msra.gmra.mrb[4].mxu0 %vm630_vm5, %v1059_v14 }
 0x8f2   : > { %v1140_v17 = vpop.f32.mrb[4].mxu0 }
 0x8f3   : > { %v1141_v16 = vadd.f32 %v1420_v15, %v1140_v17  ;;  %v1521_v18 = vpop.f32.mrb[5].mxu0 }
 0x8f5   : > { %v1144_v19 = vadd.f32 %v1141_v16, %v2497_v25 }
 0x8f7   : > { %v1145_v20 = vsel %vm630_vm5, %v1144_v19, 0.0 }
 0x8f8   : > { %1146 = vadd.xlane.f32.xlu1 %v1145_v20 }
 0x985   : > { %v1147_v21 = vpop.xlane.xlu1 %1146 }
 0x986   : > { %v1149_v22 = vmul.f32 0.03125, %v1147_v21 }
 0x988   : > { %v1150_v23 = vsub.f32 %v1144_v19, %v1149_v22 }
 0x98a   : > { %v1151_v24 = vmul.f32 %v1150_v23, %v1150_v23 }
 0x98c   : > { %v1152_v26 = vsel %vm630_vm5, %v1151_v24, 0.0 }
 0x98d   : > { %1153 = vadd.xlane.f32.xlu0 %v1152_v26 }
 0x98e   : > { %1893 = shalt.err (!%p1890_p5)
}
 0x98f   : > { %s1894_s5 = scalar_lea.hbm %s2548_s30, 256  ;;  %s1898_s9 = scalar_lea.hbm %s2731_s15, 1024 }
 0x990   : > { %p1895_p13 = scmp.ne.s32.totalorder %s2548_s30, %s1894_s5  ;;  %p1899_p0 = scmp.lt.u32.totalorder %s2548_s30, %s2731_s15 }
 0x991   : > { %p1900_p8 = scmp.lt.u32.totalorder %s1898_s9, %s1894_s5  ;;  %p1902_p10 = scmp.lt.u32.totalorder %s1894_s5, %s2548_s30 }
 0x992   : > { %p1896_p4 = pnand %p1895_p13, %p2732_p1 }
 0x993   : > { %p1901_p6 = por %p1900_p8, %p1899_p0 }
 0x994   : > { %p1897_p9 = pneg %p1896_p4 }
 0x995   : > { %p1903_p3 = por %p1902_p10, %p1901_p6 }
 0x997   : > { %p1904_p12 = pnand %p1903_p3, %p1897_p9 }
 0x999   : > { %1907 = shalt.err (!%p1904_p12)
}
 0x99a   : > { %s2063_s12 = smov 128   ;;  %s2064_s24 = smov 512  }
 0x99b   : > { %s2065_s7 = smov 8   ;;  %s2733_s11 = sld [smem:[#allocation34_spill]] }
 0x99c   : > { %1573 = dma.vmem_to_hbm [thread:$0]  (%p2732_p1), %s2551_s4, 256, %s2548_s30, %s1182_s8, %s2063_s12, %s2064_s24, %s2065_s7  }
 0x99d   : > { %s2734_s17 = sld [smem:[#allocation35_spill]]  ;;  %s1197_s6 = sshll.u32 %s2472_s29, 4  ;;  %s2591_s6 = int_to_ptr.vmem [resolvable:$true] %s1197_s6 }
 0x99e   : > { %s2735_s1 = sshll.u32 %s2540_s23, 7  ;;  %s2736_s8 = sld [smem:[#allocation36_spill]] }
 0x99f   : > { %s1177_s24 = scalar_lea.sflag [#allocation6], %s2447_s2  ;;  %s1908_s7 = scalar_lea.vmem %s2591_s6, 128 }
 0x9a0   : > { %p1909_p2 = scmp.ne.s32.totalorder %s2591_s6, %s1908_s7  ;;  %s2066_s5 = smov [#allocation13]  }
 0x9a1   : > { %v1422_v30 = vld [vmem:[%s2733_s11] ss:$0 sm:$0xff]  ;;  %s1912_s23 = sshll.u32 %s2066_s5, 4  ;;  %s1913_s23 = int_to_ptr.vmem [resolvable:$false] %s1912_s23 }
 0x9a2   : > { %p1910_p7 = pnand %p1909_p2, %p2732_p1  ;;  %s1914_s28 = scalar_lea.vmem %s1913_s23, 256 }
 0x9a3   : > { %v1423_v32 = vld [vmem:[%s2734_s17] ss:$0 sm:$0xff]  ;;  %p1915_p5 = scmp.lt.s32.totalorder %s2591_s6, %s1913_s23  ;;  %p1916_p13 = scmp.lt.s32.totalorder %s1914_s28, %s1908_s7 }
 0x9a4   : > { %s2589_s12 = scalar_lea.hbm %s2736_s8, %s2735_s1  ;;  %p1911_p11 = pneg %p1910_p7 }
 0x9a5   : > { %p1917_p4 = por %p1916_p13, %p1915_p5 }
 0x9a7   : > { %p1918_p9 = pnand %p1917_p4, %p1911_p11 }
 0xa1a   : > { %v1154_v25 = vpop.xlane.xlu0 %1153 }
 0xa1b   : > { %v1155_v27 = vmul.f32 0.03125, %v1154_v25 }
 0xa1d   : > { %v1156_v28 = vadd.f32 1e-05, %v1155_v27 }
 0xa1f   : > { %1734 = vrsqrt.f32 %v1156_v28 }
 0xa29   : > { %v1735_v29 = vpop.eup %1734 }
 0xa2a   : > { %v1158_v31 = vmul.f32 %v1735_v29, %v1150_v23 }
 0xa2c   : > { %v1166_v33 = vmul.f32 %v1422_v30, %v1158_v31 }
 0xa2e   : > { %v1174_v34 = vadd.f32 %v1423_v32, %v1166_v33 }
 0xa30   : > { %1175 = vst.msk [vmem:[%s2472_s29] sm:$0xff] %vm630_vm5, %v1174_v34 }
 0xa31   : > { %1921 = shalt.err (!%p1918_p9)
}
 0xa32   : > { %s1922_s1 = scalar_lea.hbm %s2589_s12, 128  ;;  %s1926_s11 = scalar_lea.hbm %s2736_s8, 512 }
 0xa33   : > { %p1923_p0 = scmp.ne.s32.totalorder %s2589_s12, %s1922_s1  ;;  %p1927_p10 = scmp.lt.u32.totalorder %s2589_s12, %s2736_s8 }
 0xa34   : > { %p1928_p3 = scmp.lt.u32.totalorder %s1926_s11, %s1922_s1  ;;  %p1930_p2 = scmp.lt.u32.totalorder %s1922_s1, %s2589_s12 }
 0xa35   : > { %p1924_p8 = pnand %p1923_p0, %p2732_p1 }
 0xa36   : > { %p1929_p12 = por %p1928_p3, %p1927_p10 }
 0xa37   : > { %p1925_p6 = pneg %p1924_p8 }
 0xa38   : > { %p1931_p7 = por %p1930_p2, %p1929_p12 }
 0xa3a   : > { %p1932_p11 = pnand %p1931_p7, %p1925_p6 }
 0xa3c   : > { %1935 = shalt.err (!%p1932_p11)
}
 0xa3d   : > { %1572 = dma.vmem_to_hbm [thread:$0]  (%p2732_p1), %s2591_s6, 128, %s2589_s12, %s1177_s24  }
 0xa3e PF: > { %p1607_p5 = scmp.ge.s32.totalorder %s2046_s27, 2  ;;  %s1226_s17 = sand.u32 1, %s2018_s20  }
 0xa3f   : > { %p2737_p13 = scmp.ne.s32.totalorder %s2707_s10, 0  ;;  %s1227_s30 = scalar_lea.sflag [#allocation6], %s1226_s17 }
 0xa41   : > { %p1594_p4 = pnand %p1607_p5, %p2737_p13 }
 0xa43   : > { %1997 = dma.done.wait (!%p1594_p4), %s1227_s30, 128  }
 0xa44   : > { %1999 = vsyncadd (!%p1594_p4), %s1227_s30, 4294967168  ;;  %s1236_s4 = scalar_lea.sflag [#allocation15], %s1226_s17 }
 0xa45   : > { %2001 = dma.done.wait (!%p1594_p4), %s1236_s4, 256  }
 0xa46   : > { %2003 = vsyncadd (!%p1594_p4), %s1236_s4, 4294967040  ;;  %s35_s27 = sadd.s32 1, %s2046_s27   ;;  %s2738_s13 = sld [smem:[#allocation25_spill]] }
 0xa47   : > { %p32_p9 = scmp.ge.s32.totalorder %s35_s27, 6   ;;  %s2739_s17 = smov %s2010_s18 }
 0xa48   : > { %s2740_s18 = smov %s2014_s19  ;;  %s2741_s19 = smov %s2341_s16 }
 0xa49   : > { %s2742_s20 = smov %s2022_s21  ;;  %s2743_s21 = smov %s2026_s22 }
 0xa4a   : > { %s2744_s22 = smov %s2344_s3  ;;  %s2745_s23 = smov %s2038_s25 }
 0xa4b   : > { %s2746_s24 = smov %s2042_s26  ;;  %s2747_s25 = smov %s2750_s14 }
 0xa4c   : > { %s2748_s26 = smov %s2738_s13  ;;  %34 = sbr.rel (!%p32_p9) target bundleno = 27 (0x1b), region = 152 }
 0xa53   :  { %1241 = vsyncpa [#allocation5], 1 }
 0xa54   :  { %1243 = vsyncpa [#allocation5 + $0x1], 1 }
 0xa55   :  { %1244 = vsyncpa [#allocation8], 1 }
 0xa56   :  { %1246 = vsyncpa [#allocation8 + $0x1], 1 }
 0xa57   :  { %1247 = vsyncpa [#allocation11], 1 }
 0xa58   :  { %1248 = vsyncpa [#allocation6], 1 }
 0xa59   :  { %1250 = vsyncpa [#allocation6 + $0x1], 1 }
 0xa5a   :  { %1251 = vsyncpa [#allocation15], 1 }
 0xa5b   :  { %1253 = vsyncpa [#allocation15 + $0x1], 1 }

// kernel: tpu_custom_call.1
= control target key start
LH: loop header
LB: loop body
LE: loop exit
PB: predicated region body
PF: predicated region fallthrough
CT: control target
= control target key end

     0   :  { %s2654_s0 = inlined_call_operand.hbm [shape: f32[2,16,32], index: 0, kind: input, shape index: {}]   ;;  %s2655_s1 = inlined_call_operand.hbm [shape: f32[2,16,32], index: 1, kind: input, shape index: {}]   ;;  %s2656_s2 = inlined_call_operand.hbm [shape: f32[32,32], index: 2, kind: input, shape index: {}]   ;;  %s2657_s3 = inlined_call_operand.vmem [shape: f32[1,32], index: 3, kind: input, shape index: {}]   ;;  %s2658_s4 = inlined_call_operand.hbm [shape: f32[32,64], index: 4, kind: input, shape index: {}]   ;;  %s2659_s5 = inlined_call_operand.vmem [shape: f32[1,64], index: 5, kind: input, shape index: {}]   ;;  %s2660_s6 = inlined_call_operand.hbm [shape: f32[32,32], index: 6, kind: input, shape index: {}]   ;;  %s2661_s7 = inlined_call_operand.vmem [shape: f32[1,32], index: 7, kind: input, shape index: {}]   ;;  %s2662_s8 = inlined_call_operand.vmem [shape: f32[1,32], index: 8, kind: input, shape index: {}]   ;;  %s2663_s9 = inlined_call_operand.vmem [shape: f32[1,32], index: 9, kind: input, shape index: {}]   ;;  %s2664_s10 = inlined_call_operand.hbm [shape: f32[2,16,32], index: 10, kind: output, shape index: {0}]   ;;  %s2665_s11 = inlined_call_operand.hbm [shape: f32[2,2,16,16], index: 11, kind: output, shape index: {1}]  }
   0x1   :  { %2679 = sst [smem:[#allocation26_spill]] %s2654_s0 }
   0x2   :  { %2680 = sst [smem:[#allocation27_spill]] %s2655_s1 }
   0x3   :  { %2681 = sst [smem:[#allocation28_spill]] %s2656_s2 }
   0x4   :  { %2682 = sst [smem:[#allocation29_spill]] %s2657_s3 }
   0x5   :  { %2683 = sst [smem:[#allocation30_spill]] %s2658_s4 }
   0x6   :  { %2684 = sst [smem:[#allocation31_spill]] %s2659_s5 }
   0x7   :  { %2685 = sst [smem:[#allocation32_spill]] %s2660_s6 }
   0x8   :  { %2686 = sst [smem:[#allocation33_spill]] %s2661_s7 }
   0x9   :  { %2687 = sst [smem:[#allocation34_spill]] %s2662_s8 }
   0xa   :  { %2688 = sst [smem:[#allocation35_spill]] %s2663_s9 }
   0xb   :  { %2689 = sst [smem:[#allocation36_spill]] %s2664_s10 }
   0xc   :  { %2690 = sst [smem:[#allocation37_spill]] %s2665_s11 }
   0xd   :  { %17 = vsyncpa [#allocation5], 0 }
   0xe   :  { %19 = vsyncpa [#allocation5 + $0x1], 0 }
   0xf   :  { %20 = vsyncpa [#allocation8], 0 }
  0x10   :  { %22 = vsyncpa [#allocation8 + $0x1], 0 }
  0x11   :  { %23 = vsyncpa [#allocation11], 0 }
  0x12   :  { %24 = vsyncpa [#allocation6], 0 }
  0x13   :  { %26 = vsyncpa [#allocation6 + $0x1], 0 }
  0x14   :  { %27 = vsyncpa [#allocation15], 0 }
  0x15   :  { %29 = vsyncpa [#allocation15 + $0x1], 0  ;;  %s2127_s17 = smov 0   ;;  %s2129_s18 = smov 0  }
  0x16   :  { %s2131_s19 = smov 0   ;;  %s2133_s20 = smov 0  }
  0x17   :  { %s2135_s21 = smov 0   ;;  %s2137_s22 = smov 0  }
  0x18   :  { %s2139_s23 = smov 0   ;;  %s2141_s24 = smov 0  }
  0x19   :  { %s2143_s25 = smov 0   ;;  %s2145_s26 = smov 0  }
  0x1a   :  { %s2147_s27 = smov 0  }
  0x1b LB: > { %2691 = sst [smem:[#allocation22_spill]] %s2030_s23  ;;  %s2181_s28 = sadd.s32 4294967295, %s2046_s27   ;;  %s2046_s27 = sphi %s2147_s27, %s35_s27   ;;  %s2042_s26 = sphi %s2145_s26, %s2748_s26   ;;  %s2038_s25 = sphi %s2143_s25, %s2747_s25   ;;  %s2034_s24 = sphi %s2141_s24, %s2746_s24   ;;  %s2030_s23 = sphi %s2139_s23, %s2745_s23   ;;  %s2026_s22 = sphi %s2137_s22, %s2744_s22   ;;  %s2022_s21 = sphi %s2135_s21, %s2743_s21   ;;  %s2018_s20 = sphi %s2133_s20, %s2742_s20   ;;  %s2014_s19 = sphi %s2131_s19, %s2741_s19   ;;  %s2010_s18 = sphi %s2129_s18, %s2740_s18   ;;  %s2006_s17 = sphi %s2127_s17, %s2739_s17  }
  0x1c   : > { %2692 = sst [smem:[#allocation23_spill]] %s2034_s24  ;;  %p95_p0 = scmp.ne.s32.totalorder %s2010_s18, %s2006_s17 }
  0x1d   : > { %p2668_p1 = scmp.eq.s32.totalorder %s2181_s28, 0  ;;  %p1386_p2 = scmp.ge.s32.totalorder %s2046_s27, 1 }
  0x1e   : > { %p330_p3 = scmp.lt.s32.totalorder %s2046_s27, 5  ;;  %s2048_s12 = smov [#allocation9]  }
  0x1f   : > { %p2189_p4 = por %p95_p0, %p2668_p1  ;;  %s342_s13 = sshll.u32 %s2048_s12, 4  ;;  %s2197_s13 = int_to_ptr.vmem [resolvable:$true] %s342_s13 }
  0x20   : > { %p2193_p5 = pnand %p1386_p2, %p330_p3  ;;  %s2049_s15 = smov [#allocation10]  }
  0x21   : > { %s2693_s29 = scalar_select %p2189_p4, 1, 0 }
  0x22   : > { %s2695_s30 = scalar_select %p2193_p5, 1, 0 }
  0x23   : > { %2694 = sst [smem:[#allocation24_spill]] %s2693_s29  ;;  %p1576_p6 = pneg %p2193_p5 }
  0x24   : > { %s358_s16 = sshll.u32 %s2049_s15, 4  ;;  %s2050_s17 = smov [#allocation12]   ;;  %s2207_s16 = int_to_ptr.vmem [resolvable:$true] %s358_s16 }
  0x25   : > { %p2203_p7 = pnand %p1576_p6, %p2668_p1  ;;  %s2209_s10 = sshll.u32 %s2050_s17, 4  ;;  %s375_s10 = int_to_ptr.vmem [resolvable:$true] %s2209_s10 }
  0x26   : > { %s2697_s2 = sld [smem:[#allocation28_spill]] }
  0x27   : > { %p2219_p9 = pneg %p2203_p7 }
  0x2c   : > { %s1736_s12 = scalar_lea.hbm %s2697_s2, 512 }
  0x2d   : > { %p1737_p8 = scmp.ne.s32.totalorder %s2697_s2, %s1736_s12  ;;  %p1743_p12 = scmp.lt.u32.totalorder %s1736_s12, %s2697_s2 }
  0x2f   : > { %p1739_p10 = pnand %p2219_p9, %p1737_p8 }
  0x31   : > { %p1740_p11 = pneg %p1739_p10 }
  0x33   : > { %p1745_p13 = pnand %p1743_p12, %p1740_p11 }
  0x35   : > { %1748 = shalt.err (!%p1745_p13)
}
  0x36   : > { %s1749_s7 = scalar_lea.vmem %s2197_s13, 512  ;;  %p1757_p6 = scmp.lt.s32.totalorder %s2197_s13, %s2197_s13 }
  0x37   : > { %p1750_p0 = scmp.ne.s32.totalorder %s2197_s13, %s1749_s7  ;;  %p1758_p1 = scmp.lt.s32.totalorder %s1749_s7, %s1749_s7 }
  0x39   : > { %p1752_p2 = pnand %p1750_p0, %p2219_p9  ;;  %p1759_p8 = por %p1758_p1, %p1757_p6 }
  0x3b   : > { %p1753_p3 = pneg %p1752_p2 }
  0x3d   : > { %p1760_p10 = pnand %p1759_p8, %p1753_p3 }
  0x3f   : > { %1763 = shalt.err (!%p1760_p10)
}
  0x40   : > { %s2673_s8 = smov 128   ;;  %s2674_s9 = smov 8  }
  0x41   : > { %1579 = dma.hbm_to_vmem [thread:$0]  (!%p2203_p7), %s2697_s2, 512, %s2197_s13, [#allocation8], %s2673_s8, %s2673_s8, %s2674_s9  }
  0x42   : > { %s2699_s4 = sld [smem:[#allocation30_spill]] }
  0x48   : > { %s1764_s7 = scalar_lea.hbm %s2699_s4, 512 }
  0x49   : > { %p1765_p1 = scmp.ne.s32.totalorder %s2699_s4, %s1764_s7  ;;  %p1771_p13 = scmp.lt.u32.totalorder %s1764_s7, %s2699_s4 }
  0x4b   : > { %p1767_p11 = pnand %p1765_p1, %p2219_p9 }
  0x4d   : > { %p1768_p12 = pneg %p1767_p11 }
  0x4f   : > { %p1773_p0 = pnand %p1771_p13, %p1768_p12 }
  0x51   : > { %1776 = shalt.err (!%p1773_p0)
}
  0x52   : > { %s1777_s13 = scalar_lea.vmem %s2207_s16, 512  ;;  %p1785_p8 = scmp.lt.s32.totalorder %s2207_s16, %s2207_s16 }
  0x53   : > { %p1778_p2 = scmp.ne.s32.totalorder %s2207_s16, %s1777_s13  ;;  %p1786_p10 = scmp.lt.s32.totalorder %s1777_s13, %s1777_s13 }
  0x55   : > { %p1780_p3 = pnand %p1778_p2, %p2219_p9  ;;  %p1787_p1 = por %p1786_p10, %p1785_p8 }
  0x57   : > { %p1781_p6 = pneg %p1780_p3 }
  0x59   : > { %p1788_p11 = pnand %p1787_p1, %p1781_p6 }
  0x5b   : > { %1791 = shalt.err (!%p1788_p11)
}
  0x5c   : > { %1582 = dma.hbm_to_vmem [thread:$0]  (!%p2203_p7), %s2699_s4, 512, %s2207_s16, [#allocation11], %s2673_s8, %s2673_s8, %s2674_s9  }
  0x5d   : > { %s2700_s6 = sld [smem:[#allocation32_spill]] }
  0x63   : > { %s1792_s11 = scalar_lea.hbm %s2700_s6, 512 }
  0x64   : > { %p1793_p12 = scmp.ne.s32.totalorder %s2700_s6, %s1792_s11  ;;  %p1799_p2 = scmp.lt.u32.totalorder %s1792_s11, %s2700_s6 }
  0x66   : > { %p1795_p13 = pnand %p1793_p12, %p2219_p9 }
  0x68   : > { %p1796_p0 = pneg %p1795_p13 }
  0x6a   : > { %p1801_p3 = pnand %p1799_p2, %p1796_p0 }
  0x6c   : > { %1804 = shalt.err (!%p1801_p3)
}
  0x6d   : > { %s1805_s13 = scalar_lea.vmem %s375_s10, 512  ;;  %p1813_p1 = scmp.lt.s32.totalorder %s375_s10, %s375_s10 }
  0x6e   : > { %p1806_p6 = scmp.ne.s32.totalorder %s375_s10, %s1805_s13  ;;  %p1814_p11 = scmp.lt.s32.totalorder %s1805_s13, %s1805_s13 }
  0x70   : > { %p1808_p8 = pnand %p1806_p6, %p2219_p9  ;;  %p1815_p4 = por %p1814_p11, %p1813_p1 }
  0x72   : > { %p1809_p10 = pneg %p1808_p8 }
  0x74   : > { %p1816_p5 = pnand %p1815_p4, %p1809_p10 }
  0x76   : > { %1819 = shalt.err (!%p1816_p5)
}
  0x77   : > { %1585 = dma.hbm_to_vmem [thread:$0]  (!%p2203_p7), %s2700_s6, 512, %s375_s10, [#allocation11], %s2673_s8, %s2673_s8, %s2674_s9  }
  0x78   : > { %s1385_s24 = sadd.s32 4294967294, %s2046_s27   ;;  %s44_s14 = sadd.s32 1, %s2038_s25 }
  0x79   : > { %s47_s5 = sadd.s32 1, %s2042_s26  ;;  %p45_p4 = scmp.ge.s32.totalorder %s44_s14, 2 }
  0x7a   : > { %s56_s23 = sadd.s32 1, %s2026_s22  ;;  %p63_p5 = scmp.ne.s32.totalorder %s2026_s22, %s2022_s21 }
  0x7b   : > { %p64_p9 = scmp.eq.s32.totalorder %s2046_s27, 0  ;;  %s2750_s14 = smov (%p45_p4, %s44_s14), 0 }
  0x7c   : > { %s2752_s5 = smov (!%p45_p4, %s47_s5), %s2042_s26  ;;  %s52_s10 = ssub.s32 %s2038_s25, %s2750_s14 }
  0x7d   : > { %p2306_p7 = por %p64_p9, %p63_p5  ;;  %p49_p12 = scmp.ge.s32.totalorder %s2752_s5, 2 }
  0x7e   : > { %p69_p13 = scmp.ne.s32.totalorder %s2022_s21, %s2018_s20  ;;  %s82_s11 = sadd.s32 1, %s2014_s19 }
  0x7f   : > { %p89_p0 = scmp.ne.s32.totalorder %s2014_s19, %s2010_s18  ;;  %s2754_s5 = smov (%p49_p12, %s2752_s5), 0 }
  0x80   : > { %2702 = sst [smem:[#allocation25_spill]] %s2754_s5  ;;  %p2703_p2 = scmp.eq.s32.totalorder %s2181_s28, 0 }
  0x81   : > { %p2326_p6 = por %p89_p0, %p64_p9  ;;  %s51_s17 = ssub.s32 %s2042_s26, %s2754_s5 }
  0x82   : > { %p2322_p3 = por %p2703_p2, %p69_p13  ;;  %p289_p8 = scmp.eq.s32.totalorder %s2181_s28, 3 }
  0x83   : > { %s53_s7 = sor.u32 %s52_s10, %s51_s17  ;;  %p80_p10 = scmp.eq.s32.totalorder %s51_s17, 0 }
  0x84   : > { %s2704_s12 = scalar_select %p2322_p3, 1, 0 }
  0x85   : > { %p54_p1 = scmp.eq.s32.totalorder %s53_s7, 0  ;;  %p2336_p11 = por %p289_p8, %p63_p5 }
  0x86   : > { %s2341_s16 = scalar_select %p80_p10, %s2014_s19, %s82_s11  }
  0x87   : > { %s2706_s13 = scalar_select %p2336_p11, 1, 0 }
  0x88   : > { %s2344_s3 = scalar_select %p54_p1, %s2026_s22, %s56_s23  }
  0x89   : > { %p295_p4 = scmp.eq.s32.totalorder %s1385_s24, 3  ;;  %p1603_p9 = scmp.lt.s32.totalorder %s2046_s27, 4 }
  0x8a   : > { %s397_s8 = sand.u32 1, %s2026_s22   ;;  %s1392_s9 = sshll.u32 %s2042_s26, 1 }
  0x8b   : > { %p2352_p12 = por %p295_p4, %p69_p13  ;;  %s1391_s17 = sshll.u32 %s397_s8, 3 }
  0x8c   : > { %s406_s7 = sadd.s32 %s2038_s25, %s1392_s9  ;;  %s2708_s0 = sld [smem:[#allocation26_spill]] }
  0x8d   : > { %s2707_s10 = scalar_select %p2352_p12, 1, 0 }
  0x8e   : > { %s1393_s2 = sshll.u32 %s406_s7, 7  ;;  %s401_s24 = scalar_lea.vmem [#allocation4], %s1391_s17 }
  0x8f   : > { %s410_s23 = sshll.u32 %s401_s24, 4  ;;  %p2366_p5 = pnand %p1603_p9, %p2306_p7  ;;  %s2362_s23 = int_to_ptr.vmem [resolvable:$true] %s410_s23 }
  0x90   : > { %p2372_p13 = pnand %p1603_p9, %p2326_p6  ;;  %s398_s6 = scalar_lea.sflag [#allocation5], %s397_s8 }
  0x91   : > { %p1822_p2 = pneg %p2366_p5 }
  0x92   : > { %s2360_s11 = scalar_lea.hbm %s2708_s0, %s1393_s2  ;;  %s1825_s15 = scalar_lea.hbm %s2708_s0, 512 }
  0x93   : > { %s1820_s9 = scalar_lea.hbm %s2360_s11, 128  ;;  %p1826_p6 = scmp.lt.u32.totalorder %s2360_s11, %s2708_s0 }
  0x94   : > { %p1821_p0 = scmp.ne.s32.totalorder %s2360_s11, %s1820_s9  ;;  %p1827_p10 = scmp.lt.u32.totalorder %s1825_s15, %s1820_s9 }
  0x95   : > { %p1829_p4 = scmp.lt.u32.totalorder %s1820_s9, %s2360_s11 }
  0x96   : > { %p1823_p8 = pnand %p1822_p2, %p1821_p0  ;;  %p1828_p1 = por %p1827_p10, %p1826_p6 }
  0x98   : > { %p1824_p7 = pneg %p1823_p8  ;;  %p1830_p9 = por %p1829_p4, %p1828_p1 }
  0x9a   : > { %p1831_p12 = pnand %p1830_p9, %p1824_p7 }
  0x9c   : > { %1834 = shalt.err (!%p1831_p12)
}
  0x9d   : > { %s1835_s8 = scalar_lea.vmem %s2362_s23, 128  ;;  %s2053_s29 = smov [#allocation4]  }
  0x9e   : > { %p1836_p0 = scmp.ne.s32.totalorder %s2362_s23, %s1835_s8  ;;  %s1840_s17 = sshll.u32 %s2053_s29, 4  ;;  %s1841_s17 = int_to_ptr.vmem [resolvable:$false] %s1840_s17 }
  0x9f   : > { %s1842_s7 = scalar_lea.vmem %s1841_s17, 256  ;;  %p1843_p3 = scmp.lt.s32.totalorder %s2362_s23, %s1841_s17 }
  0xa0   : > { %p1838_p8 = pnand %p1836_p0, %p1822_p2  ;;  %p1844_p6 = scmp.lt.s32.totalorder %s1842_s7, %s1835_s8 }
  0xa2   : > { %p1839_p11 = pneg %p1838_p8  ;;  %p1845_p10 = por %p1844_p6, %p1843_p3 }
  0xa4   : > { %p1846_p1 = pnand %p1845_p10, %p1839_p11 }
  0xa6   : > { %1849 = shalt.err (!%p1846_p1)
}
  0xa7   : > { %1589 = dma.hbm_to_vmem [thread:$0]  (!%p2366_p5), %s2360_s11, 128, %s2362_s23, %s398_s6  }
  0xa8   : > { %s419_s9 = sand.u32 1, %s2014_s19   ;;  %s1432_s24 = sshll.u32 %s2042_s26, 8 }
  0xa9   : > { %s1394_s15 = sshll.u32 %s419_s9, 4  ;;  %s2711_s1 = sld [smem:[#allocation27_spill]] }
  0xaa   : > { %s421_s5 = scalar_lea.vmem [#allocation7], %s1394_s15  ;;  %s2712_s7 = sand.u32 1, %s2046_s27  }
  0xab   : > { %s428_s17 = sshll.u32 %s421_s5, 4  ;;  %s2413_s0 = scalar_lea.sflag [#allocation8], %s2712_s7  ;;  %s2409_s17 = int_to_ptr.vmem [resolvable:$true] %s428_s17 }
  0xac   : > { %p1852_p11 = pneg %p2372_p13 }
  0xaf   : > { %s2407_s8 = scalar_lea.hbm %s2711_s1, %s1432_s24  ;;  %s1855_s6 = scalar_lea.hbm %s2711_s1, 512 }
  0xb0   : > { %s1850_s11 = scalar_lea.hbm %s2407_s8, 256  ;;  %p1856_p2 = scmp.lt.u32.totalorder %s2407_s8, %s2711_s1 }
  0xb1   : > { %p1851_p3 = scmp.ne.s32.totalorder %s2407_s8, %s1850_s11  ;;  %p1857_p7 = scmp.lt.u32.totalorder %s1855_s6, %s1850_s11 }
  0xb2   : > { %p1859_p9 = scmp.lt.u32.totalorder %s1850_s11, %s2407_s8 }
  0xb3   : > { %p1853_p12 = pnand %p1852_p11, %p1851_p3  ;;  %p1858_p4 = por %p1857_p7, %p1856_p2 }
  0xb5   : > { %p1854_p5 = pneg %p1853_p12  ;;  %p1860_p0 = por %p1859_p9, %p1858_p4 }
  0xb7   : > { %p1861_p8 = pnand %p1860_p0, %p1854_p5 }
  0xb9   : > { %1864 = shalt.err (!%p1861_p8)
}
  0xba   : > { %s1865_s24 = scalar_lea.vmem %s2409_s17, 256  ;;  %s2054_s29 = smov [#allocation7]  }
  0xbb   : > { %p1866_p6 = scmp.ne.s32.totalorder %s2409_s17, %s1865_s24  ;;  %s1870_s5 = sshll.u32 %s2054_s29, 4  ;;  %s1871_s5 = int_to_ptr.vmem [resolvable:$false] %s1870_s5 }
  0xbc   : > { %s1872_s7 = scalar_lea.vmem %s1871_s5, 512  ;;  %p1873_p3 = scmp.lt.s32.totalorder %s2409_s17, %s1871_s5 }
  0xbd   : > { %p1868_p10 = pnand %p1866_p6, %p1852_p11  ;;  %p1874_p12 = scmp.lt.s32.totalorder %s1872_s7, %s1865_s24 }
  0xbf   : > { %p1869_p1 = pneg %p1868_p10  ;;  %p1875_p2 = por %p1874_p12, %p1873_p3 }
  0xc1   : > { %p1876_p7 = pnand %p1875_p2, %p1869_p1 }
  0xc3   : > { %1879 = shalt.err (!%p1876_p7)
}
  0xc4   : > { %s2713_s11 = smov 8   ;;  %s2714_s23 = smov 128  }
  0xc5   : > { %1592 = dma.hbm_to_vmem [thread:$0]  (!%p2372_p13), %s2407_s8, 256, %s2409_s17, %s2413_s0, %s2714_s23, %s2714_s23, %s2713_s11  }
  0xc6   : > { %p2715_p11 = scmp.ne.s32.totalorder %s2695_s30, 0 }
  0xc7   : > { %s2447_s2 = sand.u32 (!%p2715_p11), 1, %s2022_s21   ;;  %p2716_p5 = scmp.ne.s32.totalorder (!%p2715_p11), %s2704_s12, 0 }
  0xc8   : > { %440 = sbr.rel (%p2715_p11) target bundleno = 2622 (0xa3e), region = 60  ;;  %s1398_s6 = sshll.u32 (!%p2715_p11), %s2447_s2, 3 }
  0xc9   : > { %s443_s9 = scalar_lea.sflag (!%p2715_p11), [#allocation5], %s2447_s2  ;;  %s2451_s15 = scalar_lea.vmem (!%p2715_p11), [#allocation4], %s1398_s6 }
  0xcf   : > { %1981 = dma.done.wait (%p2716_p5), %s443_s9, 128  }
  0xd0   : > { %1983 = vsyncadd (%p2716_p5), %s443_s9, 4294967168  ;;  %s2717_s0 = sld [smem:[#allocation24_spill]]  ;;  %s451_s30 = sand.u32 1, %s2181_s28  }
  0xd1   : > { %s453_s4 = sand.u32 1, %s2010_s18   ;;  %s452_s17 = scalar_lea.sflag [#allocation8], %s451_s30 }
  0xd2   : > { %s1399_s8 = sshll.u32 %s453_s4, 4 }
  0xd3   : > { %s455_s24 = scalar_lea.vmem [#allocation7], %s1399_s8 }
  0xd6   : > { %p2718_p13 = scmp.ne.s32.totalorder %s2717_s0, 0 }
  0xd8   : > { %1985 = dma.done.wait (%p2718_p13), %s452_s17, 256  }
  0xd9   : > { %1987 = vsyncadd (%p2718_p13), %s452_s17, 4294967040  ;;  %p2719_p4 = scmp.eq.s32.totalorder %s2181_s28, 0 }
  0xdb   : > { %1989 = dma.done.wait (%p2719_p4), [#allocation8], 512   ;;  %p2720_p9 = pmov %p2719_p4 }
  0xdc   : > { %p2721_p0 = pmov %p2719_p4 }
  0xdd   : > { %1991 = vsyncadd (%p2720_p9), [#allocation8], 4294966784 }
  0xde   : > { %1993 = dma.done.wait (%p2721_p0), [#allocation11], 1024   ;;  %p2722_p8 = pmov %p2721_p0 }
  0xdf   : > { %s1404_s12 = sshll.u32 %s2447_s2, 4  ;;  %s2472_s29 = scalar_lea.vmem [#allocation13], %s1398_s6 }
  0xe0   : > { %1995 = vsyncadd (%p2722_p8), [#allocation11], 4294966272  ;;  %s2474_s5 = scalar_lea.vmem [#allocation14], %s1404_s12  ;;  %s2723_s7 = sld [smem:[#allocation22_spill]] }
  0xe6   : > { %p1405_p6 = scmp.ne.s32.totalorder %s2723_s7, 0 }
  0xe7   : > { %v522_v0 = vld [vmem:[#allocation10] sm:$0xff] (!%p1405_p6)  ;;  %v523_v1 = vld [vmem:[#allocation10 + $0x8] sm:$0xff] (!%p1405_p6)  ;;  %v524_v2 = vld [vmem:[#allocation10 + $0x10] sm:$0xff] (!%p1405_p6)  ;;  %vm533_vm0 = vcmask (!%p1405_p6), 261120   ;;  %s2724_s23 = sld [smem:[#allocation31_spill]] (!%p1405_p6)  ;;  %vm615_vm1 = vcmask (!%p1405_p6), 523264  }
  0xe8   : > { %519 = sbr.rel (%p1405_p6) target bundleno = 458 (0x1ca), region = 84  ;;  %v1522_v3 = vpack.c.bf16 (!%p1405_p6), %v523_v1, %v522_v0  ;;  %v525_v4 = vld [vmem:[#allocation10 + $0x18] sm:$0xff] (!%p1405_p6)  ;;  %v520_v5 = vld [vmem:[%s455_s24] sm:$0xff] (!%p1405_p6) }
  0xe9   : > { %v1526_v6 = vpack.c.bf16 (!%p1405_p6), %v525_v4, %v524_v2  ;;  %1469 = vmatprep.mubr.msk.f32.mxu0 (!%p1405_p6), %vm533_vm0, %v520_v5  ;;  %v521_v7 = vld [vmem:[%s455_s24 + $0x8] sm:$0xff] (!%p1405_p6) }
  0xea   : > { %1523 = vmatprep.subr.bf16.mxu0 (!%p1405_p6), %v1522_v3 }
  0xeb   : > { %1525 = vmatpush3.bf16.msra.mxu0 (!%p1405_p6), %v1522_v3 }
  0xec   : > { %1527 = vmatprep.subr.bf16.mxu0 (!%p1405_p6), %v1526_v6 }
  0xed   : > { %v1406_v8 = vld [vmem:[%s2724_s23] ss:$0 sm:$0xff] (!%p1405_p6) }
  0xef   : > { %1529 = vmatpush3.bf16.msra.mxu0 %v1526_v6 }
  0xf2   : > { %1470 = vmatmul.mubr.msk.f32.vlgmr.msra.gmra.mrb[0].mxu0 %vm533_vm0, %v521_v7 }
 0x1c5   : > { %v1471_v9 = vpop.f32.mrb[0].mxu0 }
 0x1c6   : > { %v612_v10 = vadd.f32 %v1471_v9, %v1406_v8  ;;  %v606_v11 = vpop.f32.mrb[1].mxu0 }
 0x1c7   : > { %v607_v12 = vadd.f32 %v1406_v8, %v606_v11 }
 0x1c8   : > { %617 = vst.msk [vmem:[#allocation2 + $0x8] sm:$0xff] %vm615_vm1, %v612_v10 }
 0x1c9   : > { %616 = vst.msk [vmem:[#allocation2] sm:$0xff] %vm615_vm1, %v607_v12 }
 0x1ca PF: > { %v619_v13 = vld [vmem:[#allocation9] sm:$0xff]  ;;  %v620_v14 = vld [vmem:[#allocation9 + $0x8] sm:$0xff]  ;;  %v621_v15 = vld [vmem:[#allocation9 + $0x10] sm:$0xff]  ;;  %v2055_v16 = vmov 0.0|0.0   ;;  %vm2056_vm2 = vmmov 0   ;;  %v2057_v19 = vmov 0.0  }
 0x1cb   : > { %1530 = vmatprep.subr.bf16.mxu0 %v2055_v16  ;;  %v1531_v17 = vpack.c.bf16 %v620_v14, %v619_v13  ;;  %v622_v18 = vld [vmem:[#allocation9 + $0x18] sm:$0xff]  ;;  %1480 = vmatprep.mubr.msk.f32.mxu0 %vm2056_vm2, %v2057_v19  ;;  %vm707_vm3 = vcmask 130048   ;;  %vm630_vm5 = vcmask 261120   ;;  %s2727_s0 = sld [smem:[#allocation29_spill]]  ;;  %s2059_s30 = smov 112   ;;  %v1060_v5 = vld [vmem:[#allocation12] sm:$0xff] }
 0x1cc   : > { %1536 = vmatprep.subr.bf16.mxu1 %v2055_v16  ;;  %vm2486_vm4 = vmpackc.low %vm707_vm3, %vm707_vm3  ;;  %1487 = vmatprep.mubr.msk.f32.mxu1 %vm2056_vm2, %v2057_v19  ;;  %v1534_v23 = vpack.c.bf16 %v622_v18, %v621_v15  ;;  %v2497_v25 = vld [vmem:[%s2451_s15] sm:$0xff]  ;;  %s2058_s15 = smov 96   ;;  %s2060_s4 = smov 80   ;;  %v1061_v6 = vld [vmem:[#allocation12 + $0x8] sm:$0xff]  ;;  %vm1057_vm6 = vcmask 261248  }
 0x1cd   : > { %1532 = vmatpush3.bf16.msra.mxu0 %v1531_v17  ;;  %v1551_v7 = vpack.c.bf16 %v1061_v6, %v1060_v5  ;;  %v1062_v8 = vld [vmem:[#allocation12 + $0x10] sm:$0xff]  ;;  %v1063_v9 = vld [vmem:[#allocation12 + $0x18] sm:$0xff]  ;;  %s2061_s8 = smov 16   ;;  %s2728_s17 = sld [smem:[#allocation23_spill]] }
 0x1ce   : > { %1533 = vmatprep.subr.bf16.mxu0 %v2055_v16  ;;  %v1554_v10 = vpack.c.bf16 %v1063_v9, %v1062_v8  ;;  %s2729_s24 = sld [smem:[#allocation22_spill]]  ;;  %s2730_s28 = sld [smem:[#allocation33_spill]] }
 0x1cf   : > { %v706_v21 = vld [vmem:[#allocation2 + $0x8] sm:$0xff]  ;;  %p2732_p1 = scmp.ne.s32.totalorder %s2706_s13, 0 }
 0x1d0   : > { %v705_v20 = vld [vmem:[#allocation2] sm:$0xff] }
 0x1d1   : > { %v1537_v24 = vpack.c.bf16 %v706_v21, %v705_v20  ;;  %1535 = vmatpush3.bf16.msra.mxu0 %v1534_v23  ;;  %v1409_v26 = vld [vmem:[%s2727_s0] ss:$0 sm:$0xff]  ;;  %v1711_v34 = vpack.i.bf16 %v706_v21, %v705_v20 }
 0x1d2   : > { %1547 = vmatprep.subr.bf16.mxu0 %v2055_v16 }
 0x1d3   : > { %1539 = vmatpush3.bf16.xpose.msk.msra.mxu1 %vm2486_vm4, %v1537_v24  ;;  %1712 = vrot.lane.b32.xlu1 %v1711_v34, %s2058_s15  ;;  %s1426_s11 = sshll.u32 %s2728_s17, 1  ;;  %s2731_s15 = sld [smem:[#allocation37_spill]] }
 0x1d4   : > { %1540 = vmatprep.subr.bf16.mxu1 %v2055_v16  ;;  %1481 = vmatmul.mubr.msk.f32.vlgmr.msra.gmra.mrb[0].mxu0 %vm630_vm5, %v2497_v25  ;;  %v1420_v15 = vld [vmem:[%s2730_s28] ss:$0 sm:$0xff]  ;;  %s2540_s23 = sadd.s32 %s2729_s24, %s1426_s11  ;;  %s2062_s17 = smov [#allocation14]  }
 0x1d5   : > { %1508 = vmatprep.mubr.msk.f32.mxu0 %vm2056_vm2, %v2057_v19  ;;  %s2678_s6 = sshll.u32 %s2540_s23, 7  ;;  %s1884_s24 = sshll.u32 %s2062_s17, 4  ;;  %s1885_s24 = int_to_ptr.vmem [resolvable:$false] %s1884_s24 }
 0x1d6   : > { %s1886_s7 = scalar_lea.vmem %s1885_s24, 512 }
 0x1d7   : > { %1717 = vrot.lane.b32.xlu1 %v1711_v34, %s2059_s30 }
 0x245   : > { %v1713_v40 = vpop.permute.xlu1 %1712 }
 0x246   : > { %v1715_v41 = vunpack.i.h.bf16 %v1713_v40  ;;  %v1714_v42 = vunpack.i.l.bf16 %v1713_v40 }
 0x248   : > { %v1541_v43 = vpack.c.bf16 %v1715_v41, %v1714_v42 }
 0x249   : > { %v1718_v45 = vpop.permute.xlu1 %1717 }
 0x24a   : > { %v1720_v46 = vunpack.i.h.bf16 %v1718_v45  ;;  %v1719_v47 = vunpack.i.l.bf16 %v1718_v45 }
 0x24c   : > { %v1544_v49 = vpack.c.bf16 %v1720_v46, %v1719_v47 }
 0x2a7   : > { %v700_v27 = vpop.f32.mrb[0].mxu0 }
 0x2a8   : > { %v701_v28 = vadd.f32 %v1409_v26, %v700_v27  ;;  %v1482_v29 = vpop.f32.mrb[1].mxu0 }
 0x2aa   : > { %v704_v30 = vmul.f32 0.25, %v701_v28 }
 0x2ac   : > { %1488 = vmatmul.mubr.msk.f32.vlgmr.msra.gmra.mrb[0].mxu1 %vm707_vm3, %v704_v30 }
 0x2ad   : > { %1494 = vmatprep.mubr.msk.f32.mxu1 %vm2056_vm2, %v2057_v19  ;;  %1542 = vmatpush3.bf16.msra.mxu1 %v1541_v43 }
 0x2ae   : > { %1543 = vmatprep.subr.bf16.mxu1 %v2055_v16 }
 0x37f   : > { %v783_v31 = vpop.f32.mrb[0].mxu1 }
 0x380   : > { %v1489_v32 = vpop.f32.mrb[1].mxu1  ;;  %v787_v33 = vsel %vm707_vm3, %v783_v31, -inf }
 0x381   : > { %788 = vmax.xlane.f32.xlu0 %v787_v33 }
 0x40e   : > { %v789_v35 = vpop.xlane.xlu0 %788 }
 0x40f   : > { %v790_v36 = vsub.f32 %v783_v31, %v789_v35 }
 0x411   : > { %v791_v37 = vmul.f32 1.442695, %v790_v36 }
 0x413   : > { %1726 = vpow2.f32 %v791_v37 }
 0x41d   : > { %v1727_v38 = vpop.eup %1726 }
 0x41e   : > { %v793_v39 = vsel %vm707_vm3, %v1727_v38, 0.0 }
 0x41f   : > { %794 = vadd.xlane.f32.xlu0 %v793_v39 }
 0x435   : > { %879 = vrot.lane.b32.xlu0 %v704_v30, %s2059_s30  ;;  %s2548_s30 = scalar_lea.hbm %s2731_s15, %s2678_s6 }
 0x4ac   : > { %v795_v44 = vpop.xlane.xlu0 %794 }
 0x4ad   : > { %1728 = vrcp.f32 %v795_v44 }
 0x4b0   : > { %v880_v51 = vpop.permute.xlu0 %879 }
 0x4b7   : > { %v1729_v48 = vpop.eup %1728 }
 0x4b8   : > { %v797_v50 = vmul.f32 %v1729_v48, %v1727_v38 }
 0x4ba   : > { %798 = vst.msk [vmem:[%s2474_s5] sm:$0xff] %vm707_vm3, %v797_v50  ;;  %1495 = vmatmul.mubr.msk.f32.vlgmr.msra.gmra.mrb[2].mxu1 %vm707_vm3, %v797_v50 }
 0x4bb   : > { %1546 = vmatpush3.bf16.xpose.msk.msra.mxu1 %vm2486_vm4, %v1544_v49  ;;  %1501 = vmatprep.mubr.msk.f32.mxu1 %vm2056_vm2, %v2057_v19 }
 0x4c2   : > { %1502 = vmatmul.mubr.msk.f32.vlgmr.msra.gmra.mrb[4].mxu1 %vm707_vm3, %v880_v51 }
 0x58d   : > { %v874_v52 = vpop.f32.mrb[2].mxu1 }
 0x58e   : > { %878 = vst.msk [vmem:[#allocation3] sm:$0xff] %vm707_vm3, %v874_v52  ;;  %v1496_v53 = vpop.f32.mrb[3].mxu1 }
 0x595   : > { %v957_v54 = vpop.f32.mrb[4].mxu1 }
 0x596   : > { %v1503_v55 = vpop.f32.mrb[5].mxu1  ;;  %v961_v56 = vsel %vm707_vm3, %v957_v54, -inf }
 0x597   : > { %962 = vmax.xlane.f32.xlu1 %v961_v56 }
 0x5a8   : > { %1722 = vrot.lane.b32.xlu1 %v1711_v34, %s2060_s4  ;;  %s1211_s4 = sshll.u32 %s2474_s5, 4  ;;  %s2551_s4 = int_to_ptr.vmem [resolvable:$true] %s1211_s4 }
 0x5a9   : > { %s1880_s12 = scalar_lea.vmem %s2551_s4, 256  ;;  %p1887_p2 = scmp.lt.s32.totalorder %s2551_s4, %s1885_s24 }
 0x5aa   : > { %p1881_p10 = scmp.ne.s32.totalorder %s2551_s4, %s1880_s12  ;;  %p1888_p7 = scmp.lt.s32.totalorder %s1886_s7, %s1880_s12 }
 0x5ac   : > { %p1882_p3 = pnand %p1881_p10, %p2732_p1  ;;  %p1889_p11 = por %p1888_p7, %p1887_p2 }
 0x5ae   : > { %p1883_p12 = pneg %p1882_p3 }
 0x5b0   : > { %p1890_p5 = pnand %p1889_p11, %p1883_p12 }
 0x624   : > { %v963_v57 = vpop.xlane.xlu1 %962 }
 0x625   : > { %v964_v58 = vsub.f32 %v957_v54, %v963_v57 }
 0x627   : > { %v965_v59 = vmul.f32 1.442695, %v964_v58 }
 0x628   : > { %v1723_v62 = vpop.permute.xlu1 %1722 }
 0x629   : > { %1730 = vpow2.f32 %v965_v59  ;;  %v1725_v63 = vunpack.i.h.bf16 %v1723_v62  ;;  %v1724_v0 = vunpack.i.l.bf16 %v1723_v62 }
 0x62b   : > { %v1548_v1 = vpack.c.bf16 %v1725_v63, %v1724_v0 }
 0x62d   : > { %1549 = vmatpush3.bf16.msra.mxu0 %v1548_v1 }
 0x62e   : > { %1550 = vmatprep.subr.bf16.mxu0 %v2055_v16 }
 0x633   : > { %v1731_v60 = vpop.eup %1730 }
 0x634   : > { %v967_v61 = vsel %vm707_vm3, %v1731_v60, 0.0 }
 0x635   : > { %968 = vadd.xlane.f32.xlu0 %v967_v61 }
 0x6c2   : > { %v969_v2 = vpop.xlane.xlu0 %968 }
 0x6c3   : > { %1732 = vrcp.f32 %v969_v2 }
 0x6cd   : > { %v1733_v3 = vpop.eup %1732 }
 0x6ce   : > { %v971_v4 = vmul.f32 %v1733_v3, %v1731_v60 }
 0x6d0   : > { %1418 = vst.msk [vmem:[%s2474_s5 + $0x8] sm:$0xff] %vm707_vm3, %v971_v4  ;;  %1509 = vmatmul.mubr.msk.f32.vlgmr.msra.gmra.mrb[2].mxu0 %vm707_vm3, %v971_v4 }
 0x6d1   : > { %1519 = vmatprep.mubr.msk.f32.mxu0 %vm2056_vm2, %v2057_v19  ;;  %1552 = vmatpush3.bf16.msra.mxu0 %v1551_v7 }
 0x6d2   : > { %1553 = vmatprep.subr.bf16.mxu0 %v2055_v16 }
 0x6d5   : > { %1555 = vmatpush3.bf16.msra.mxu0 %v1554_v10 }
 0x7a3   : > { %v1049_v11 = vpop.f32.mrb[2].mxu0 }
 0x7a4   : > { %1054 = vrot.lane.b32.xlu0 %v1049_v11, %s2061_s8  ;;  %v1510_v12 = vpop.f32.mrb[3].mxu0  ;;  %s1182_s8 = scalar_lea.sflag [#allocation15], %s2447_s2 }
 0x816   : > { %v1055_v13 = vpop.permute.xlu0 %1054 }
 0x817   : > { %1058 = vst.msk [vmem:[#allocation3] sm:$0xff] %vm1057_vm6, %v1055_v13 }
 0x81e   : > { %v1059_v14 = vld [vmem:[#allocation3] sm:$0xff] }
 0x81f   : > { %1520 = vmatmul.mubr.msk.f32.vlgmr.msra.gmra.mrb[4].mxu0 %vm630_vm5, %v1059_v14 }
 0x8f2   : > { %v1140_v17 = vpop.f32.mrb[4].mxu0 }
 0x8f3   : > { %v1141_v16 = vadd.f32 %v1420_v15, %v1140_v17  ;;  %v1521_v18 = vpop.f32.mrb[5].mxu0 }
 0x8f5   : > { %v1144_v19 = vadd.f32 %v1141_v16, %v2497_v25 }
 0x8f7   : > { %v1145_v20 = vsel %vm630_vm5, %v1144_v19, 0.0 }
 0x8f8   : > { %1146 = vadd.xlane.f32.xlu1 %v1145_v20 }
 0x985   : > { %v1147_v21 = vpop.xlane.xlu1 %1146 }
 0x986   : > { %v1149_v22 = vmul.f32 0.03125, %v1147_v21 }
 0x988   : > { %v1150_v23 = vsub.f32 %v1144_v19, %v1149_v22 }
 0x98a   : > { %v1151_v24 = vmul.f32 %v1150_v23, %v1150_v23 }
 0x98c   : > { %v1152_v26 = vsel %vm630_vm5, %v1151_v24, 0.0 }
 0x98d   : > { %1153 = vadd.xlane.f32.xlu0 %v1152_v26 }
 0x98e   : > { %1893 = shalt.err (!%p1890_p5)
}
 0x98f   : > { %s1894_s5 = scalar_lea.hbm %s2548_s30, 256  ;;  %s1898_s9 = scalar_lea.hbm %s2731_s15, 1024 }
 0x990   : > { %p1895_p13 = scmp.ne.s32.totalorder %s2548_s30, %s1894_s5  ;;  %p1899_p0 = scmp.lt.u32.totalorder %s2548_s30, %s2731_s15 }
 0x991   : > { %p1900_p8 = scmp.lt.u32.totalorder %s1898_s9, %s1894_s5  ;;  %p1902_p10 = scmp.lt.u32.totalorder %s1894_s5, %s2548_s30 }
 0x992   : > { %p1896_p4 = pnand %p1895_p13, %p2732_p1 }
 0x993   : > { %p1901_p6 = por %p1900_p8, %p1899_p0 }
 0x994   : > { %p1897_p9 = pneg %p1896_p4 }
 0x995   : > { %p1903_p3 = por %p1902_p10, %p1901_p6 }
 0x997   : > { %p1904_p12 = pnand %p1903_p3, %p1897_p9 }
 0x999   : > { %1907 = shalt.err (!%p1904_p12)
}
 0x99a   : > { %s2063_s12 = smov 128   ;;  %s2064_s24 = smov 512  }
 0x99b   : > { %s2065_s7 = smov 8   ;;  %s2733_s11 = sld [smem:[#allocation34_spill]] }
 0x99c   : > { %1573 = dma.vmem_to_hbm [thread:$0]  (%p2732_p1), %s2551_s4, 256, %s2548_s30, %s1182_s8, %s2063_s12, %s2064_s24, %s2065_s7  }
 0x99d   : > { %s2734_s17 = sld [smem:[#allocation35_spill]]  ;;  %s1197_s6 = sshll.u32 %s2472_s29, 4  ;;  %s2591_s6 = int_to_ptr.vmem [resolvable:$true] %s1197_s6 }
 0x99e   : > { %s2735_s1 = sshll.u32 %s2540_s23, 7  ;;  %s2736_s8 = sld [smem:[#allocation36_spill]] }
 0x99f   : > { %s1177_s24 = scalar_lea.sflag [#allocation6], %s2447_s2  ;;  %s1908_s7 = scalar_lea.vmem %s2591_s6, 128 }
 0x9a0   : > { %p1909_p2 = scmp.ne.s32.totalorder %s2591_s6, %s1908_s7  ;;  %s2066_s5 = smov [#allocation13]  }
 0x9a1   : > { %v1422_v30 = vld [vmem:[%s2733_s11] ss:$0 sm:$0xff]  ;;  %s1912_s23 = sshll.u32 %s2066_s5, 4  ;;  %s1913_s23 = int_to_ptr.vmem [resolvable:$false] %s1912_s23 }
 0x9a2   : > { %p1910_p7 = pnand %p1909_p2, %p2732_p1  ;;  %s1914_s28 = scalar_lea.vmem %s1913_s23, 256 }
 0x9a3   : > { %v1423_v32 = vld [vmem:[%s2734_s17] ss:$0 sm:$0xff]  ;;  %p1915_p5 = scmp.lt.s32.totalorder %s2591_s6, %s1913_s23  ;;  %p1916_p13 = scmp.lt.s32.totalorder %s1914_s28, %s1908_s7 }
 0x9a4   : > { %s2589_s12 = scalar_lea.hbm %s2736_s8, %s2735_s1  ;;  %p1911_p11 = pneg %p1910_p7 }
 0x9a5   : > { %p1917_p4 = por %p1916_p13, %p1915_p5 }
 0x9a7   : > { %p1918_p9 = pnand %p1917_p4, %p1911_p11 }
 0xa1a   : > { %v1154_v25 = vpop.xlane.xlu0 %1153 }
 0xa1b   : > { %v1155_v27 = vmul.f32 0.03125, %v1154_v25 }
 0xa1d   : > { %v1156_v28 = vadd.f32 1e-05, %v1155_v27 }
 0xa1f   : > { %1734 = vrsqrt.f32 %v1156_v28 }
 0xa29   : > { %v1735_v29 = vpop.eup %1734 }
 0xa2a   : > { %v1158_v31 = vmul.f32 %v1735_v29, %v1150_v23 }
 0xa2c   : > { %v1166_v33 = vmul.f32 %v1422_v30, %v1158_v31 }
 0xa2e   : > { %v1174_v34 = vadd.f32 %v1423_v32, %v1166_v33 }
 0xa30   : > { %1175 = vst.msk [vmem:[%s2472_s29] sm:$0xff] %vm630_vm5, %v1174_v34 }
 0xa31   : > { %1921 = shalt.err (!%p1918_p9)
}
 0xa32   : > { %s1922_s1 = scalar_lea.hbm %s2589_s12, 128  ;;  %s1926_s11 = scalar_lea.hbm %s2736_s8, 512 }
 0xa33   : > { %p1923_p0 = scmp.ne.s32.totalorder %s2589_s12, %s1922_s1  ;;  %p1927_p10 = scmp.lt.u32.totalorder %s2589_s12, %s2736_s8 }
 0xa34   : > { %p1928_p3 = scmp.lt.u32.totalorder %s1926_s11, %s1922_s1  ;;  %p1930_p2 = scmp.lt.u32.totalorder %s1922_s1, %s2589_s12 }
 0xa35   : > { %p1924_p8 = pnand %p1923_p0, %p2732_p1 }
 0xa36   : > { %p1929_p12 = por %p1928_p3, %p1927_p10 }
 0xa37   : > { %p1925_p6 = pneg %p1924_p8 }
 0xa38   : > { %p1931_p7 = por %p1930_p2, %p1929_p12 }
 0xa3a   : > { %p1932_p11 = pnand %p1931_p7, %p1925_p6 }
 0xa3c   : > { %1935 = shalt.err (!%p1932_p11)
}
 0xa3d   : > { %1572 = dma.vmem_to_hbm [thread:$0]  (%p2732_p1), %s2591_s6, 128, %s2589_s12, %s1177_s24  }
 0xa3e PF: > { %p1607_p5 = scmp.ge.s32.totalorder %s2046_s27, 2  ;;  %s1226_s17 = sand.u32 1, %s2018_s20  }
 0xa3f   : > { %p2737_p13 = scmp.ne.s32.totalorder %s2707_s10, 0  ;;  %s1227_s30 = scalar_lea.sflag [#allocation6], %s1226_s17 }
 0xa41   : > { %p1594_p4 = pnand %p1607_p5, %p2737_p13 }
 0xa43   : > { %1997 = dma.done.wait (!%p1594_p4), %s1227_s30, 128  }
 0xa44   : > { %1999 = vsyncadd (!%p1594_p4), %s1227_s30, 4294967168  ;;  %s1236_s4 = scalar_lea.sflag [#allocation15], %s1226_s17 }
 0xa45   : > { %2001 = dma.done.wait (!%p1594_p4), %s1236_s4, 256  }
 0xa46   : > { %2003 = vsyncadd (!%p1594_p4), %s1236_s4, 4294967040  ;;  %s35_s27 = sadd.s32 1, %s2046_s27   ;;  %s2738_s13 = sld [smem:[#allocation25_spill]] }
 0xa47   : > { %p32_p9 = scmp.ge.s32.totalorder %s35_s27, 6   ;;  %s2739_s17 = smov %s2010_s18 }
 0xa48   : > { %s2740_s18 = smov %s2014_s19  ;;  %s2741_s19 = smov %s2341_s16 }
 0xa49   : > { %s2742_s20 = smov %s2022_s21  ;;  %s2743_s21 = smov %s2026_s22 }
 0xa4a   : > { %s2744_s22 = smov %s2344_s3  ;;  %s2745_s23 = smov %s2038_s25 }
 0xa4b   : > { %s2746_s24 = smov %s2042_s26  ;;  %s2747_s25 = smov %s2750_s14 }
 0xa4c   : > { %s2748_s26 = smov %s2738_s13  ;;  %34 = sbr.rel (!%p32_p9) target bundleno = 27 (0x1b), region = 152 }
 0xa53   :  { %1241 = vsyncpa [#allocation5], 1 }
 0xa54   :  { %1243 = vsyncpa [#allocation5 + $0x1], 1 }
 0xa55   :  { %1244 = vsyncpa [#allocation8], 1 }
 0xa56   :  { %1246 = vsyncpa [#allocation8 + $0x1], 1 }
 0xa57   :  { %1247 = vsyncpa [#allocation11], 1 }
 0xa58   :  { %1248 = vsyncpa [#allocation6], 1 }
 0xa59   :  { %1250 = vsyncpa [#allocation6 + $0x1], 1 }
 0xa5a   :  { %1251 = vsyncpa [#allocation15], 1 }
 0xa5b   :  { %1253 = vsyncpa [#allocation15 + $0x1], 1 }

</bundles_post_ra>
